<compile_context>
chip_gen: v5e
topology: v5e:2x2
jax: 0.10.0
libtpu: 0.0.40
codegen_flags: <defaults>
</compile_context>

<pallas_src>
import functools

import jax
import jax.numpy as jnp
from jax import lax
from jax.experimental import pallas as pl
from jax.experimental.pallas import tpu as pltpu


# ----------------------------------------------------------------------------
# Helpers
# ----------------------------------------------------------------------------
@functools.lru_cache(maxsize=None)
def _vmem_limit_bytes():
    """~75% of physical VMEM (96 MiB on v5e/v6e, 48 MiB on v7x); conservative
    48 MiB when the hardware query is unavailable."""
    cap = 64 * 1024 * 1024
    try:
        info = pltpu.get_tpu_info()
        cap = int(getattr(info, "vmem_capacity_bytes", cap))
    except Exception:
        pass
    return (cap * 3) // 4


def _compiler_params(dimension_semantics):
    return pltpu.CompilerParams(dimension_semantics=dimension_semantics,
                                vmem_limit_bytes=_vmem_limit_bytes())


def _pick_block(n, candidates):
    """Largest candidate that evenly divides n, else n itself (full dim)."""
    for c in candidates:
        if n >= c and n % c == 0:
            return c
    return n


# ----------------------------------------------------------------------------
# Kernel 1: hoisted input projection  Gx_dir = sum_i x_i @ W_ih_dir_i + b_dir
# ----------------------------------------------------------------------------
def _input_proj_kernel(*refs, n_in):
    """refs = x_parts[n_in], wf_parts[n_in], wr_parts[n_in], b_f, b_r, gf, gr.

    x_parts[i]: (bm, feat_i) bf16     wf/wr_parts[i]: (feat_i, 4H) bf16
    b_f/b_r:    (1, 4H) f32           gf/gr:          (bm, 4H) bf16 outputs
    """
    xs = refs[:n_in]
    wfs = refs[n_in:2 * n_in]
    wrs = refs[2 * n_in:3 * n_in]
    bf_ref = refs[3 * n_in]
    br_ref = refs[3 * n_in + 1]
    gf_ref = refs[3 * n_in + 2]
    gr_ref = refs[3 * n_in + 3]

    gf = bf_ref[...]                                   # (1, 4H) f32, broadcasts
    gr = br_ref[...]
    for i in range(n_in):
        xi = xs[i][...]
        gf = gf + jnp.dot(xi, wfs[i][...], preferred_element_type=jnp.float32)
        gr = gr + jnp.dot(xi, wrs[i][...], preferred_element_type=jnp.float32)
    gf_ref[...] = gf.astype(jnp.bfloat16)
    gr_ref[...] = gr.astype(jnp.bfloat16)


def _input_projection(x2d_parts, wf_parts, wr_parts, b_f, b_r, hidden):
    n = len(x2d_parts)
    M = x2d_parts[0].shape[0]
    four_h = 4 * hidden
    bm = _pick_block(M, (512, 256, 128, 64, 32, 16, 8))

    in_specs = (
        [pl.BlockSpec((bm, xp.shape[1]), lambda m: (m, 0)) for xp in x2d_parts]
        + [pl.BlockSpec(w.shape, lambda m: (0, 0)) for w in wf_parts]
        + [pl.BlockSpec(w.shape, lambda m: (0, 0)) for w in wr_parts]
        + [pl.BlockSpec((1, four_h), lambda m: (0, 0)),
           pl.BlockSpec((1, four_h), lambda m: (0, 0))]
    )
    gx_sds = jax.ShapeDtypeStruct((M, four_h), jnp.bfloat16)
    out_specs = (pl.BlockSpec((bm, four_h), lambda m: (m, 0)),
                 pl.BlockSpec((bm, four_h), lambda m: (m, 0)))
    return pl.pallas_call(
        functools.partial(_input_proj_kernel, n_in=n),
        out_shape=(gx_sds, gx_sds),
        grid=(M // bm,),
        in_specs=in_specs,
        out_specs=out_specs,
        compiler_params=_compiler_params(("parallel",)),
    )(*x2d_parts, *wf_parts, *wr_parts, b_f, b_r)


# ----------------------------------------------------------------------------
# Kernel 2: fused fwd+rev LSTM recurrence, Gx streamed in time chunks
# ----------------------------------------------------------------------------
def _bilstm_recurrence_kernel(gxf_ref, gxr_ref, whf_ref, whr_ref,
                              of_ref, or_ref,
                              hf_s, cf_s, hr_s, cr_s, *, hidden):
    """One (batch tile, time chunk) grid cell.

    gxf_ref: (tc, bb, 4H) bf16   forward-gates chunk   (original times ascending)
    gxr_ref: (tc, bb, 4H) bf16   reverse-gates chunk   (chunk nt-1-t of gx_rev)
    whf/whr: (H, 4H) bf16        recurrent weights (resident across the grid)
    of_ref:  (tc, bb, H) bf16    forward outputs for this chunk
    or_ref:  (tc, bb, H) bf16    reverse outputs (written to chunk nt-1-t)
    hf/cf/hr/cr scratch: (bb, H) f32 carries, persist across time chunks
    """
    H = hidden
    tc = gxf_ref.shape[0]

    @pl.when(pl.program_id(1) == 0)
    def _init():
        hf_s[...] = jnp.zeros_like(hf_s)
        cf_s[...] = jnp.zeros_like(cf_s)
        hr_s[...] = jnp.zeros_like(hr_s)
        cr_s[...] = jnp.zeros_like(cr_s)

    whf = whf_ref[...]
    whr = whr_ref[...]

    def cell(gates, c_prev):
        # PyTorch gate order: i, f, g, o
        i = jax.nn.sigmoid(gates[:, 0 * H:1 * H])
        f = jax.nn.sigmoid(gates[:, 1 * H:2 * H])
        g = jnp.tanh(gates[:, 2 * H:3 * H])
        o = jax.nn.sigmoid(gates[:, 3 * H:4 * H])
        c = f * c_prev + i * g
        h = o * jnp.tanh(c)
        return h, c

    def step(s, carry):
        h_f, c_f, h_r, c_r = carry
        sr = tc - 1 - s                       # reverse dir walks the chunk backwards
        g_f = gxf_ref[s].astype(jnp.float32) + jnp.dot(
            h_f.astype(jnp.bfloat16), whf, preferred_element_type=jnp.float32)
        h_f, c_f = cell(g_f, c_f)
        of_ref[s] = h_f.astype(jnp.bfloat16)

        g_r = gxr_ref[sr].astype(jnp.float32) + jnp.dot(
            h_r.astype(jnp.bfloat16), whr, preferred_element_type=jnp.float32)
        h_r, c_r = cell(g_r, c_r)
        or_ref[sr] = h_r.astype(jnp.bfloat16)
        return h_f, c_f, h_r, c_r

    carry0 = (hf_s[...], cf_s[...], hr_s[...], cr_s[...])
    h_f, c_f, h_r, c_r = lax.fori_loop(0, tc, step, carry0)
    hf_s[...] = h_f
    cf_s[...] = c_f
    hr_s[...] = h_r
    cr_s[...] = c_r


def _recurrence_tiles(T, B, hidden, budget):
    bb_cands = [c for c in (128, 64, 32, 16, 8) if c <= B and B % c == 0]
    # Prefer >= 2 batch grid cells (keeps both v7x TensorCores busy) as long as
    # the batch tile still fills a decent fraction of the MXU rows.
    pref = [c for c in bb_cands if B // c >= 2 and c >= 64]
    bb_cands = pref or bb_cands or [B]
    tc_cands = [c for c in (32, 16, 8) if c <= T and T % c == 0] or [T]

    def est(bb, tc):
        gx = 2 * 2 * tc * bb * 4 * hidden * 2       # 2 dirs, double-buffered, bf16
        out = 2 * 2 * tc * bb * hidden * 2
        w = 2 * hidden * 4 * hidden * 2
        scr = 4 * bb * hidden * 4
        return gx + out + w + scr

    for bb in bb_cands:
        for tc in tc_cands:
            if est(bb, tc) <= budget:
                return bb, tc
    return bb_cands[-1], tc_cands[-1]


def _bilstm_recurrence(gxf, gxr, whh_f, whh_r, hidden):
    T, B, four_h = gxf.shape
    bb, tc = _recurrence_tiles(T, B, hidden, _vmem_limit_bytes() // 3)
    nt = T // tc
    out_sds = jax.ShapeDtypeStruct((T, B, hidden), jnp.bfloat16)
    return pl.pallas_call(
        functools.partial(_bilstm_recurrence_kernel, hidden=hidden),
        out_shape=(out_sds, out_sds),
        grid=(B // bb, nt),
        in_specs=[
            pl.BlockSpec((tc, bb, four_h), lambda b, t: (t, b, 0)),
            pl.BlockSpec((tc, bb, four_h), lambda b, t: (nt - 1 - t, b, 0)),
            pl.BlockSpec((hidden, four_h), lambda b, t: (0, 0)),
            pl.BlockSpec((hidden, four_h), lambda b, t: (0, 0)),
        ],
        out_specs=(
            pl.BlockSpec((tc, bb, hidden), lambda b, t: (t, b, 0)),
            pl.BlockSpec((tc, bb, hidden), lambda b, t: (nt - 1 - t, b, 0)),
        ),
        scratch_shapes=[pltpu.VMEM((bb, hidden), jnp.float32) for _ in range(4)],
        compiler_params=_compiler_params(("parallel", "arbitrary")),
    )(gxf, gxr, whh_f, whh_r)


# ----------------------------------------------------------------------------
# Kernel 3: attention scores -> masked online softmax over time -> pool -> head
# ----------------------------------------------------------------------------
def _attn_pool_kernel(hf_ref, hr_ref, mask_ref, waf_ref, war_ref, ba_ref,
                      wof_ref, wor_ref, bo_ref, out_ref,
                      m_s, l_s, pf_s, pr_s):
    """One (batch tile, time chunk) grid cell.  Online (flash-style) softmax
    over time, pooled accumulators in f32 scratch, scalar head at the end."""
    t = pl.program_id(1)
    nt = pl.num_programs(1)

    @pl.when(t == 0)
    def _init():
        m_s[...] = jnp.full_like(m_s, -jnp.inf)
        l_s[...] = jnp.zeros_like(l_s)
        pf_s[...] = jnp.zeros_like(pf_s)
        pr_s[...] = jnp.zeros_like(pr_s)

    hf = hf_ref[...].astype(jnp.float32)                       # (tc, Bb, H)
    hr = hr_ref[...].astype(jnp.float32)
    s = (jnp.sum(hf * waf_ref[...], axis=-1)
         + jnp.sum(hr * war_ref[...], axis=-1)
         + ba_ref[...])                                        # (tc, Bb)
    s = jnp.where(mask_ref[...] == 0.0, -1e9, s)               # masked_fill

    m_prev = m_s[...]                                          # (1, Bb)
    m_new = jnp.maximum(m_prev, jnp.max(s, axis=0, keepdims=True))
    alpha = jnp.exp(m_prev - m_new)                            # (1, Bb)
    p = jnp.exp(s - m_new)                                     # (tc, Bb)
    alpha_c = jnp.swapaxes(alpha, 0, 1)                        # (Bb, 1)
    l_s[...] = alpha * l_s[...] + jnp.sum(p, axis=0, keepdims=True)
    pf_s[...] = alpha_c * pf_s[...] + jnp.sum(p[:, :, None] * hf, axis=0)
    pr_s[...] = alpha_c * pr_s[...] + jnp.sum(p[:, :, None] * hr, axis=0)
    m_s[...] = m_new

    @pl.when(t == nt - 1)
    def _finalize():
        inv_l = jnp.swapaxes(1.0 / l_s[...], 0, 1)             # (Bb, 1)
        pooled_f = pf_s[...] * inv_l                           # (Bb, H)
        pooled_r = pr_s[...] * inv_l
        # N=1 head as a VPU multiply + lane reduce (no 1-wide MXU matmul)
        out_ref[...] = (
            jnp.sum(pooled_f * wof_ref[...], axis=-1, keepdims=True)
            + jnp.sum(pooled_r * wor_ref[...], axis=-1, keepdims=True)
            + bo_ref[...])


def _attention_tiles(T, B, hidden, budget):
    # Tile the batch only when a 128-lane-aligned tile exists (keeps the (T,B)
    # mask block legal); otherwise keep the full batch resident.
    bba = 128 if (B % 128 == 0 and B > 128) else B
    tc_cands = [c for c in (64, 32, 16, 8) if c <= T and T % c == 0] or [T]

    def est(tca):
        return (2 * 2 * tca * bba * hidden * 2    # hf/hr chunks, double-buffered
                + 2 * tca * bba * 4               # mask chunk
                + 2 * bba * hidden * 4            # pooled accumulators
                + 16 * bba)

    for tca in tc_cands:
        if est(tca) <= budget:
            return bba, tca
    return bba, tc_cands[-1]


def _attention_head(h_f, h_r, mask_tb, params, hidden):
    T, B, H = h_f.shape
    bba, tca = _attention_tiles(T, B, hidden, _vmem_limit_bytes() // 3)
    nt = T // tca
    out = pl.pallas_call(
        _attn_pool_kernel,
        out_shape=jax.ShapeDtypeStruct((B, 1), jnp.float32),
        grid=(B // bba, nt),
        in_specs=[
            pl.BlockSpec((tca, bba, H), lambda b, t: (t, b, 0)),
            pl.BlockSpec((tca, bba, H), lambda b, t: (t, b, 0)),
            pl.BlockSpec((tca, bba), lambda b, t: (t, b)),
            pl.BlockSpec((1, H), lambda b, t: (0, 0)),
            pl.BlockSpec((1, H), lambda b, t: (0, 0)),
            pl.BlockSpec((1, 1), lambda b, t: (0, 0)),
            pl.BlockSpec((1, H), lambda b, t: (0, 0)),
            pl.BlockSpec((1, H), lambda b, t: (0, 0)),
            pl.BlockSpec((1, 1), lambda b, t: (0, 0)),
        ],
        out_specs=pl.BlockSpec((bba, 1), lambda b, t: (b, 0)),
        scratch_shapes=[
            pltpu.VMEM((1, bba), jnp.float32),
            pltpu.VMEM((1, bba), jnp.float32),
            pltpu.VMEM((bba, H), jnp.float32),
            pltpu.VMEM((bba, H), jnp.float32),
        ],
        compiler_params=_compiler_params(("parallel", "arbitrary")),
    )(h_f, h_r, mask_tb,
      params["attn_w_f"], params["attn_w_r"], params["attn_b"],
      params["out_w_f"], params["out_w_r"], params["out_b"])
    return out[:, 0]


# ----------------------------------------------------------------------------
# Top-level wrapper
# ----------------------------------------------------------------------------
def bilstm_with_attention(x, params, attention_mask=None, *, hidden):
    """Eval-mode forward of BiLSTMWithAttention.

    x: (B, T, input_dim) f32; attention_mask: optional (B, T), 0 = masked.
    Returns (B,) f32.
    """
    B, T, _ = x.shape

    # Single layout op: go time-major once; everything downstream is (T, B, .).
    h_parts = [jnp.transpose(x, (1, 0, 2)).astype(jnp.bfloat16)]      # (T, B, D)
    for lp in params["lstm"]:
        x2d_parts = [p.reshape(T * B, p.shape[-1]) for p in h_parts]  # free reshape
        gxf, gxr = _input_projection(x2d_parts, lp["wih_f"], lp["wih_r"],
                                     lp["b_f"], lp["b_r"], hidden)
        gxf = gxf.reshape(T, B, 4 * hidden)
        gxr = gxr.reshape(T, B, 4 * hidden)
        h_f, h_r = _bilstm_recurrence(gxf, gxr, lp["whh_f"], lp["whh_r"], hidden)
        h_parts = [h_f, h_r]
        # TODO(synk): nn.LSTM inter-layer dropout (p=0.1) is training-only; eval
        # semantics (no dropout) are implemented here.

    if attention_mask is None:
        mask_tb = jnp.ones((T, B), jnp.float32)
    else:
        mask_tb = jnp.transpose((attention_mask != 0).astype(jnp.float32))  # (T, B)
    return _attention_head(h_parts[0], h_parts[1], mask_tb, params, hidden)


# ----------------------------------------------------------------------------
# Deterministic parameter initialization (mirrors nn.LSTM / nn.Linear shapes)
# ----------------------------------------------------------------------------
def init_params(key, input_dim, hidden, num_layers):
    def unif(k, shape, bound):
        return jax.random.uniform(k, shape, jnp.float32, -bound, bound)

    k_lstm = 1.0 / (hidden ** 0.5)
    layers = []
    for layer in range(num_layers):
        in_dim = input_dim if layer == 0 else 2 * hidden
        lp = {}
        for tag in ("f", "r"):                                  # fwd, rev
            key, k1, k2, k3, k4 = jax.random.split(key, 5)
            w_ih = unif(k1, (4 * hidden, in_dim), k_lstm).T     # (in_dim, 4H)
            w_hh = unif(k2, (4 * hidden, hidden), k_lstm).T     # (H, 4H)
            b = (unif(k3, (4 * hidden,), k_lstm)
                 + unif(k4, (4 * hidden,), k_lstm))[None, :]    # (1, 4H) f32
            if layer == 0:
                wih_parts = (w_ih.astype(jnp.bfloat16),)
            else:  # split so (h_fwd, h_rev) are consumed without an HBM concat
                wih_parts = (w_ih[:hidden].astype(jnp.bfloat16),
                             w_ih[hidden:].astype(jnp.bfloat16))
            lp["wih_" + tag] = wih_parts
            lp["whh_" + tag] = w_hh.astype(jnp.bfloat16)
            lp["b_" + tag] = b
        layers.append(lp)

    k_lin = 1.0 / ((2 * hidden) ** 0.5)
    key, k1, k2, k3, k4 = jax.random.split(key, 5)
    attn_w = unif(k1, (1, 2 * hidden), k_lin)
    out_w = unif(k3, (1, 2 * hidden), k_lin)
    return {
        "lstm": layers,
        "attn_w_f": attn_w[:, :hidden],            # (1, H) f32
        "attn_w_r": attn_w[:, hidden:],
        "attn_b": unif(k2, (1, 1), k_lin),
        "out_w_f": out_w[:, :hidden],              # (1, H) f32
        "out_w_r": out_w[:, hidden:],
        "out_b": unif(k4, (1, 1), k_lin),
    }


# ----------------------------------------------------------------------------
if __name__ == "__main__":
    B, T, D, H, L = 2, 8, 32, 32, 2

    key = jax.random.PRNGKey(0)
    key, kx, kp = jax.random.split(key, 3)
    x = jax.random.normal(kx, (B, T, D), jnp.float32)
    params = init_params(kp, D, H, L)

    fwd = jax.jit(functools.partial(bilstm_with_attention, hidden=H))

    y = jax.block_until_ready(fwd(x, params, None))
    assert y.shape == (B,)
    assert bool(jnp.all(jnp.isfinite(y)))

    # Also exercise the masked-attention path (last two timesteps padded).
    attn_mask = jnp.ones((B, T), jnp.int32).at[:, T - 2:].set(0)
    y_masked = jax.block_until_ready(fwd(x, params, attn_mask))
    assert y_masked.shape == (B,)
    assert bool(jnp.all(jnp.isfinite(y_masked)))

    print("KERNEL_OK")
</pallas_src>

<mosaic_0001>
module attributes {stable_mosaic.version = 11 : i64} {
  func.func @_input_proj_kernel(%arg0: i32, %arg1: memref<16x32xbf16, #tpu.memory_space<vmem>>, %arg2: memref<32x128xbf16, #tpu.memory_space<vmem>>, %arg3: memref<32x128xbf16, #tpu.memory_space<vmem>>, %arg4: memref<1x128xf32, #tpu.memory_space<vmem>>, %arg5: memref<1x128xf32, #tpu.memory_space<vmem>>, %arg6: memref<16x128xbf16, #tpu.memory_space<vmem>>, %arg7: memref<16x128xbf16, #tpu.memory_space<vmem>>) attributes {dimension_semantics = [#tpu.dimension_semantics<parallel>], iteration_bounds = array<i64: 1>, scalar_prefetch = 0 : i64, scratch_operands = 0 : i64, tpu.core_type = #tpu.core_type<tc>, window_params = [{transform_indices = @transform_0, window_bounds = array<i64: 16, 32>}, {pipeline_mode = #tpu.pipeline_mode<synchronous>, transform_indices = @transform_1, window_bounds = array<i64: 32, 128>}, {pipeline_mode = #tpu.pipeline_mode<synchronous>, transform_indices = @transform_2, window_bounds = array<i64: 32, 128>}, {pipeline_mode = #tpu.pipeline_mode<synchronous>, transform_indices = @transform_3, window_bounds = array<i64: 1, 128>}, {pipeline_mode = #tpu.pipeline_mode<synchronous>, transform_indices = @transform_4, window_bounds = array<i64: 1, 128>}, {transform_indices = @transform_5, window_bounds = array<i64: 16, 128>}, {transform_indices = @transform_6, window_bounds = array<i64: 16, 128>}]} {
    %c0 = arith.constant 0 : index
    %c0_0 = arith.constant 0 : index
    %0 = vector.load %arg4[%c0, %c0_0] : memref<1x128xf32, #tpu.memory_space<vmem>>, vector<1x128xf32>
    %c0_1 = arith.constant 0 : index
    %c0_2 = arith.constant 0 : index
    %1 = vector.load %arg5[%c0_1, %c0_2] : memref<1x128xf32, #tpu.memory_space<vmem>>, vector<1x128xf32>
    %c0_3 = arith.constant 0 : index
    %c0_4 = arith.constant 0 : index
    %2 = vector.load %arg1[%c0_3, %c0_4] : memref<16x32xbf16, #tpu.memory_space<vmem>>, vector<16x32xbf16>
    %c0_5 = arith.constant 0 : index
    %c0_6 = arith.constant 0 : index
    %3 = vector.load %arg2[%c0_5, %c0_6] : memref<32x128xbf16, #tpu.memory_space<vmem>>, vector<32x128xbf16>
    %cst = arith.constant dense<0.000000e+00> : vector<16x128xf32>
    %4 = tpu.matmul %2, %3, %cst {dimension_numbers = #tpu.dot_dimension_numbers<[1], [0], [0], [1], [0, 0, 1, 1], [], []>} : vector<16x32xbf16>, vector<32x128xbf16>, vector<16x128xf32> -> vector<16x128xf32>
    %5 = vector.broadcast %0 : vector<1x128xf32> to vector<16x128xf32>
    %6 = arith.addf %5, %4 : vector<16x128xf32>
    %c0_7 = arith.constant 0 : index
    %c0_8 = arith.constant 0 : index
    %7 = vector.load %arg3[%c0_7, %c0_8] : memref<32x128xbf16, #tpu.memory_space<vmem>>, vector<32x128xbf16>
    %cst_9 = arith.constant dense<0.000000e+00> : vector<16x128xf32>
    %8 = tpu.matmul %2, %7, %cst_9 {dimension_numbers = #tpu.dot_dimension_numbers<[1], [0], [0], [1], [0, 0, 1, 1], [], []>} : vector<16x32xbf16>, vector<32x128xbf16>, vector<16x128xf32> -> vector<16x128xf32>
    %9 = vector.broadcast %1 : vector<1x128xf32> to vector<16x128xf32>
    %10 = arith.addf %9, %8 : vector<16x128xf32>
    %11 = arith.truncf %6 : vector<16x128xf32> to vector<16x128xbf16>
    %c0_10 = arith.constant 0 : index
    %c0_11 = arith.constant 0 : index
    %12 = vector.load %arg6[%c0_10, %c0_11] : memref<16x128xbf16, #tpu.memory_space<vmem>>, vector<16x128xbf16>
    tpu.vector_store %arg6[%c0_10, %c0_11], %11 {strides = array<i32>} : memref<16x128xbf16, #tpu.memory_space<vmem>>, vector<16x128xbf16>,
    %13 = arith.truncf %10 : vector<16x128xf32> to vector<16x128xbf16>
    %c0_12 = arith.constant 0 : index
    %c0_13 = arith.constant 0 : index
    %14 = vector.load %arg7[%c0_12, %c0_13] : memref<16x128xbf16, #tpu.memory_space<vmem>>, vector<16x128xbf16>
    tpu.vector_store %arg7[%c0_12, %c0_13], %13 {strides = array<i32>} : memref<16x128xbf16, #tpu.memory_space<vmem>>, vector<16x128xbf16>,
    return
  }
  func.func @transform_0(%arg0: i32) -> (i32, i32) {
    %c0_i32 = arith.constant 0 : i32
    %c0_i32_0 = arith.constant 0 : i32
    return %arg0, %c0_i32 : i32, i32
  }
  func.func @transform_1(%arg0: i32) -> (i32, i32) {
    %c0_i32 = arith.constant 0 : i32
    %c0_i32_0 = arith.constant 0 : i32
    %c0_i32_1 = arith.constant 0 : i32
    return %c0_i32, %c0_i32_0 : i32, i32
  }
  func.func @transform_2(%arg0: i32) -> (i32, i32) {
    %c0_i32 = arith.constant 0 : i32
    %c0_i32_0 = arith.constant 0 : i32
    %c0_i32_1 = arith.constant 0 : i32
    return %c0_i32, %c0_i32_0 : i32, i32
  }
  func.func @transform_3(%arg0: i32) -> (i32, i32) {
    %c0_i32 = arith.constant 0 : i32
    %c0_i32_0 = arith.constant 0 : i32
    %c0_i32_1 = arith.constant 0 : i32
    return %c0_i32, %c0_i32_0 : i32, i32
  }
  func.func @transform_4(%arg0: i32) -> (i32, i32) {
    %c0_i32 = arith.constant 0 : i32
    %c0_i32_0 = arith.constant 0 : i32
    %c0_i32_1 = arith.constant 0 : i32
    return %c0_i32, %c0_i32_0 : i32, i32
  }
  func.func @transform_5(%arg0: i32) -> (i32, i32) {
    %c0_i32 = arith.constant 0 : i32
    %c0_i32_0 = arith.constant 0 : i32
    return %arg0, %c0_i32 : i32, i32
  }
  func.func @transform_6(%arg0: i32) -> (i32, i32) {
    %c0_i32 = arith.constant 0 : i32
    %c0_i32_0 = arith.constant 0 : i32
    return %arg0, %c0_i32 : i32, i32
  }
}

module attributes {stable_mosaic.version = 11 : i64} {
  func.func @_bilstm_recurrence_kernel(%arg0: i32, %arg1: i32, %arg2: memref<8x2x128xbf16, #tpu.memory_space<vmem>>, %arg3: memref<8x2x128xbf16, #tpu.memory_space<vmem>>, %arg4: memref<32x128xbf16, #tpu.memory_space<vmem>>, %arg5: memref<32x128xbf16, #tpu.memory_space<vmem>>, %arg6: memref<8x2x32xbf16, #tpu.memory_space<vmem>>, %arg7: memref<8x2x32xbf16, #tpu.memory_space<vmem>>, %arg8: memref<2x32xf32, #tpu.memory_space<vmem>>, %arg9: memref<2x32xf32, #tpu.memory_space<vmem>>, %arg10: memref<2x32xf32, #tpu.memory_space<vmem>>, %arg11: memref<2x32xf32, #tpu.memory_space<vmem>>) attributes {dimension_semantics = [#tpu.dimension_semantics<parallel>, #tpu.dimension_semantics<arbitrary>], iteration_bounds = array<i64: 1, 1>, scalar_prefetch = 0 : i64, scratch_operands = 4 : i64, tpu.core_type = #tpu.core_type<tc>, window_params = [{transform_indices = @transform_0, window_bounds = array<i64: 8, 2, 128>}, {transform_indices = @transform_1, window_bounds = array<i64: 8, 2, 128>}, {pipeline_mode = #tpu.pipeline_mode<synchronous>, transform_indices = @transform_2, window_bounds = array<i64: 32, 128>}, {pipeline_mode = #tpu.pipeline_mode<synchronous>, transform_indices = @transform_3, window_bounds = array<i64: 32, 128>}, {transform_indices = @transform_4, window_bounds = array<i64: 8, 2, 32>}, {transform_indices = @transform_5, window_bounds = array<i64: 8, 2, 32>}]} {
    %c0_i32 = arith.constant 0 : i32
    %0 = arith.cmpi eq, %arg1, %c0_i32 : i32
    %1 = arith.extui %0 : i1 to i32
    %c0_i32_0 = arith.constant 0 : i32
    %2 = arith.cmpi ne, %1, %c0_i32_0 : i32
    scf.if %2 {
      %cst = arith.constant 0.000000e+00 : f32
      %15 = vector.broadcast %cst : f32 to vector<2x32xf32>
      %c0_22 = arith.constant 0 : index
      %c0_23 = arith.constant 0 : index
      %16 = vector.load %arg8[%c0_22, %c0_23] : memref<2x32xf32, #tpu.memory_space<vmem>>, vector<2x32xf32>
      tpu.vector_store %arg8[%c0_22, %c0_23], %15 {strides = array<i32>} : memref<2x32xf32, #tpu.memory_space<vmem>>, vector<2x32xf32>,
      %cst_24 = arith.constant 0.000000e+00 : f32
      %17 = vector.broadcast %cst_24 : f32 to vector<2x32xf32>
      %c0_25 = arith.constant 0 : index
      %c0_26 = arith.constant 0 : index
      %18 = vector.load %arg9[%c0_25, %c0_26] : memref<2x32xf32, #tpu.memory_space<vmem>>, vector<2x32xf32>
      tpu.vector_store %arg9[%c0_25, %c0_26], %17 {strides = array<i32>} : memref<2x32xf32, #tpu.memory_space<vmem>>, vector<2x32xf32>,
      %cst_27 = arith.constant 0.000000e+00 : f32
      %19 = vector.broadcast %cst_27 : f32 to vector<2x32xf32>
      %c0_28 = arith.constant 0 : index
      %c0_29 = arith.constant 0 : index
      %20 = vector.load %arg10[%c0_28, %c0_29] : memref<2x32xf32, #tpu.memory_space<vmem>>, vector<2x32xf32>
      tpu.vector_store %arg10[%c0_28, %c0_29], %19 {strides = array<i32>} : memref<2x32xf32, #tpu.memory_space<vmem>>, vector<2x32xf32>,
      %cst_30 = arith.constant 0.000000e+00 : f32
      %21 = vector.broadcast %cst_30 : f32 to vector<2x32xf32>
      %c0_31 = arith.constant 0 : index
      %c0_32 = arith.constant 0 : index
      %22 = vector.load %arg11[%c0_31, %c0_32] : memref<2x32xf32, #tpu.memory_space<vmem>>, vector<2x32xf32>
      tpu.vector_store %arg11[%c0_31, %c0_32], %21 {strides = array<i32>} : memref<2x32xf32, #tpu.memory_space<vmem>>, vector<2x32xf32>,
    } else {
    }
    %c0 = arith.constant 0 : index
    %c0_1 = arith.constant 0 : index
    %3 = vector.load %arg4[%c0, %c0_1] : memref<32x128xbf16, #tpu.memory_space<vmem>>, vector<32x128xbf16>
    %c0_2 = arith.constant 0 : index
    %c0_3 = arith.constant 0 : index
    %4 = vector.load %arg5[%c0_2, %c0_3] : memref<32x128xbf16, #tpu.memory_space<vmem>>, vector<32x128xbf16>
    %c0_4 = arith.constant 0 : index
    %c0_5 = arith.constant 0 : index
    %5 = vector.load %arg8[%c0_4, %c0_5] : memref<2x32xf32, #tpu.memory_space<vmem>>, vector<2x32xf32>
    %c0_6 = arith.constant 0 : index
    %c0_7 = arith.constant 0 : index
    %6 = vector.load %arg9[%c0_6, %c0_7] : memref<2x32xf32, #tpu.memory_space<vmem>>, vector<2x32xf32>
    %c0_8 = arith.constant 0 : index
    %c0_9 = arith.constant 0 : index
    %7 = vector.load %arg10[%c0_8, %c0_9] : memref<2x32xf32, #tpu.memory_space<vmem>>, vector<2x32xf32>
    %c0_10 = arith.constant 0 : index
    %c0_11 = arith.constant 0 : index
    %8 = vector.load %arg11[%c0_10, %c0_11] : memref<2x32xf32, #tpu.memory_space<vmem>>, vector<2x32xf32>
    %c0_i32_12 = arith.constant 0 : i32
    %c8_i32 = arith.constant 8 : i32
    %9 = arith.addi %c0_i32_12, %c8_i32 : i32
    %c1_i32 = arith.constant 1 : i32
    %10:4 = scf.for %arg12 = %c0_i32_12 to %9 step %c1_i32 iter_args(%arg13 = %5, %arg14 = %6, %arg15 = %7, %arg16 = %8) -> (vector<2x32xf32>, vector<2x32xf32>, vector<2x32xf32>, vector<2x32xf32>)  : i32 {
      %c7_i32 = arith.constant 7 : i32
      %15 = arith.subi %c7_i32, %arg12 : i32
      %16 = arith.index_cast %arg12 : i32 to index
      %c0_22 = arith.constant 0 : index
      %c0_23 = arith.constant 0 : index
      %17 = vector.load %arg2[%16, %c0_22, %c0_23] : memref<8x2x128xbf16, #tpu.memory_space<vmem>>, vector<1x2x128xbf16>
      %18 = vector.shape_cast %17 : vector<1x2x128xbf16> to vector<2x128xbf16>
      %19 = arith.extf %18 : vector<2x128xbf16> to vector<2x128xf32>
      %20 = arith.truncf %arg13 : vector<2x32xf32> to vector<2x32xbf16>
      %cst = arith.constant dense<0.000000e+00> : vector<2x128xf32>
      %21 = tpu.matmul %20, %3, %cst {dimension_numbers = #tpu.dot_dimension_numbers<[1], [0], [0], [1], [0, 0, 1, 1], [], []>} : vector<2x32xbf16>, vector<32x128xbf16>, vector<2x128xf32> -> vector<2x128xf32>
      %22 = arith.addf %19, %21 : vector<2x128xf32>
      %23 = vector.extract_strided_slice %22 {offsets = [0, 0], sizes = [2, 32], strides = [1, 1]} : vector<2x128xf32> to vector<2x32xf32>
      %24 = arith.negf %23 : vector<2x32xf32>
      %25 = math.exp %24 : vector<2x32xf32>
      %cst_24 = arith.constant 1.000000e+00 : f32
      %26 = vector.broadcast %cst_24 : f32 to vector<2x32xf32>
      %27 = arith.addf %26, %25 : vector<2x32xf32>
      %28 = arith.divf %26, %27 : vector<2x32xf32>
      %29 = vector.extract_strided_slice %22 {offsets = [0, 32], sizes = [2, 32], strides = [1, 1]} : vector<2x128xf32> to vector<2x32xf32>
      %30 = arith.negf %29 : vector<2x32xf32>
      %31 = math.exp %30 : vector<2x32xf32>
      %cst_25 = arith.constant 1.000000e+00 : f32
      %32 = vector.broadcast %cst_25 : f32 to vector<2x32xf32>
      %33 = arith.addf %32, %31 : vector<2x32xf32>
      %34 = arith.divf %32, %33 : vector<2x32xf32>
      %35 = vector.extract_strided_slice %22 {offsets = [0, 64], sizes = [2, 32], strides = [1, 1]} : vector<2x128xf32> to vector<2x32xf32>
      %36 = math.tanh %35 : vector<2x32xf32>
      %37 = vector.extract_strided_slice %22 {offsets = [0, 96], sizes = [2, 32], strides = [1, 1]} : vector<2x128xf32> to vector<2x32xf32>
      %38 = arith.negf %37 : vector<2x32xf32>
      %39 = math.exp %38 : vector<2x32xf32>
      %cst_26 = arith.constant 1.000000e+00 : f32
      %40 = vector.broadcast %cst_26 : f32 to vector<2x32xf32>
      %41 = arith.addf %40, %39 : vector<2x32xf32>
      %42 = arith.divf %40, %41 : vector<2x32xf32>
      %43 = arith.mulf %34, %arg14 : vector<2x32xf32>
      %44 = arith.mulf %28, %36 : vector<2x32xf32>
      %45 = arith.addf %43, %44 : vector<2x32xf32>
      %46 = math.tanh %45 : vector<2x32xf32>
      %47 = arith.mulf %42, %46 : vector<2x32xf32>
      %48 = arith.truncf %47 : vector<2x32xf32> to vector<2x32xbf16>
      %49 = arith.index_cast %arg12 : i32 to index
      %c0_27 = arith.constant 0 : index
      %c0_28 = arith.constant 0 : index
      %50 = vector.load %arg6[%49, %c0_27, %c0_28] : memref<8x2x32xbf16, #tpu.memory_space<vmem>>, vector<1x2x32xbf16>
      %51 = vector.shape_cast %50 : vector<1x2x32xbf16> to vector<2x32xbf16>
      %52 = vector.shape_cast %48 : vector<2x32xbf16> to vector<1x2x32xbf16>
      tpu.vector_store %arg6[%49, %c0_27, %c0_28], %52 {strides = array<i32>} : memref<8x2x32xbf16, #tpu.memory_space<vmem>>, vector<1x2x32xbf16>,
      %53 = arith.index_cast %15 : i32 to index
      %c0_29 = arith.constant 0 : index
      %c0_30 = arith.constant 0 : index
      %54 = vector.load %arg3[%53, %c0_29, %c0_30] : memref<8x2x128xbf16, #tpu.memory_space<vmem>>, vector<1x2x128xbf16>
      %55 = vector.shape_cast %54 : vector<1x2x128xbf16> to vector<2x128xbf16>
      %56 = arith.extf %55 : vector<2x128xbf16> to vector<2x128xf32>
      %57 = arith.truncf %arg15 : vector<2x32xf32> to vector<2x32xbf16>
      %cst_31 = arith.constant dense<0.000000e+00> : vector<2x128xf32>
      %58 = tpu.matmul %57, %4, %cst_31 {dimension_numbers = #tpu.dot_dimension_numbers<[1], [0], [0], [1], [0, 0, 1, 1], [], []>} : vector<2x32xbf16>, vector<32x128xbf16>, vector<2x128xf32> -> vector<2x128xf32>
      %59 = arith.addf %56, %58 : vector<2x128xf32>
      %60 = vector.extract_strided_slice %59 {offsets = [0, 0], sizes = [2, 32], strides = [1, 1]} : vector<2x128xf32> to vector<2x32xf32>
      %61 = arith.negf %60 : vector<2x32xf32>
      %62 = math.exp %61 : vector<2x32xf32>
      %cst_32 = arith.constant 1.000000e+00 : f32
      %63 = vector.broadcast %cst_32 : f32 to vector<2x32xf32>
      %64 = arith.addf %63, %62 : vector<2x32xf32>
      %65 = arith.divf %63, %64 : vector<2x32xf32>
      %66 = vector.extract_strided_slice %59 {offsets = [0, 32], sizes = [2, 32], strides = [1, 1]} : vector<2x128xf32> to vector<2x32xf32>
      %67 = arith.negf %66 : vector<2x32xf32>
      %68 = math.exp %67 : vector<2x32xf32>
      %cst_33 = arith.constant 1.000000e+00 : f32
      %69 = vector.broadcast %cst_33 : f32 to vector<2x32xf32>
      %70 = arith.addf %69, %68 : vector<2x32xf32>
      %71 = arith.divf %69, %70 : vector<2x32xf32>
      %72 = vector.extract_strided_slice %59 {offsets = [0, 64], sizes = [2, 32], strides = [1, 1]} : vector<2x128xf32> to vector<2x32xf32>
      %73 = math.tanh %72 : vector<2x32xf32>
      %74 = vector.extract_strided_slice %59 {offsets = [0, 96], sizes = [2, 32], strides = [1, 1]} : vector<2x128xf32> to vector<2x32xf32>
      %75 = arith.negf %74 : vector<2x32xf32>
      %76 = math.exp %75 : vector<2x32xf32>
      %cst_34 = arith.constant 1.000000e+00 : f32
      %77 = vector.broadcast %cst_34 : f32 to vector<2x32xf32>
      %78 = arith.addf %77, %76 : vector<2x32xf32>
      %79 = arith.divf %77, %78 : vector<2x32xf32>
      %80 = arith.mulf %71, %arg16 : vector<2x32xf32>
      %81 = arith.mulf %65, %73 : vector<2x32xf32>
      %82 = arith.addf %80, %81 : vector<2x32xf32>
      %83 = math.tanh %82 : vector<2x32xf32>
      %84 = arith.mulf %79, %83 : vector<2x32xf32>
      %85 = arith.truncf %84 : vector<2x32xf32> to vector<2x32xbf16>
      %86 = arith.index_cast %15 : i32 to index
      %c0_35 = arith.constant 0 : index
      %c0_36 = arith.constant 0 : index
      %87 = vector.load %arg7[%86, %c0_35, %c0_36] : memref<8x2x32xbf16, #tpu.memory_space<vmem>>, vector<1x2x32xbf16>
      %88 = vector.shape_cast %87 : vector<1x2x32xbf16> to vector<2x32xbf16>
      %89 = vector.shape_cast %85 : vector<2x32xbf16> to vector<1x2x32xbf16>
      tpu.vector_store %arg7[%86, %c0_35, %c0_36], %89 {strides = array<i32>} : memref<8x2x32xbf16, #tpu.memory_space<vmem>>, vector<1x2x32xbf16>,
      scf.yield %47, %45, %84, %82 : vector<2x32xf32>, vector<2x32xf32>, vector<2x32xf32>, vector<2x32xf32>
    }
    %c8_i32_13 = arith.constant 8 : i32
    %c0_14 = arith.constant 0 : index
    %c0_15 = arith.constant 0 : index
    %11 = vector.load %arg8[%c0_14, %c0_15] : memref<2x32xf32, #tpu.memory_space<vmem>>, vector<2x32xf32>
    tpu.vector_store %arg8[%c0_14, %c0_15], %10#0 {strides = array<i32>} : memref<2x32xf32, #tpu.memory_space<vmem>>, vector<2x32xf32>,
    %c0_16 = arith.constant 0 : index
    %c0_17 = arith.constant 0 : index
    %12 = vector.load %arg9[%c0_16, %c0_17] : memref<2x32xf32, #tpu.memory_space<vmem>>, vector<2x32xf32>
    tpu.vector_store %arg9[%c0_16, %c0_17], %10#1 {strides = array<i32>} : memref<2x32xf32, #tpu.memory_space<vmem>>, vector<2x32xf32>,
    %c0_18 = arith.constant 0 : index
    %c0_19 = arith.constant 0 : index
    %13 = vector.load %arg10[%c0_18, %c0_19] : memref<2x32xf32, #tpu.memory_space<vmem>>, vector<2x32xf32>
    tpu.vector_store %arg10[%c0_18, %c0_19], %10#2 {strides = array<i32>} : memref<2x32xf32, #tpu.memory_space<vmem>>, vector<2x32xf32>,
    %c0_20 = arith.constant 0 : index
    %c0_21 = arith.constant 0 : index
    %14 = vector.load %arg11[%c0_20, %c0_21] : memref<2x32xf32, #tpu.memory_space<vmem>>, vector<2x32xf32>
    tpu.vector_store %arg11[%c0_20, %c0_21], %10#3 {strides = array<i32>} : memref<2x32xf32, #tpu.memory_space<vmem>>, vector<2x32xf32>,
    return
  }
  func.func @transform_0(%arg0: i32, %arg1: i32) -> (i32, i32, i32) {
    %c0_i32 = arith.constant 0 : i32
    %c0_i32_0 = arith.constant 0 : i32
    return %arg1, %arg0, %c0_i32 : i32, i32, i32
  }
  func.func @transform_1(%arg0: i32, %arg1: i32) -> (i32, i32, i32) {
    %c0_i32 = arith.constant 0 : i32
    %0 = arith.subi %c0_i32, %arg1 : i32
    %c0_i32_0 = arith.constant 0 : i32
    %c0_i32_1 = arith.constant 0 : i32
    return %0, %arg0, %c0_i32_0 : i32, i32, i32
  }
  func.func @transform_2(%arg0: i32, %arg1: i32) -> (i32, i32) {
    %c0_i32 = arith.constant 0 : i32
    %c0_i32_0 = arith.constant 0 : i32
    %c0_i32_1 = arith.constant 0 : i32
    return %c0_i32, %c0_i32_0 : i32, i32
  }
  func.func @transform_3(%arg0: i32, %arg1: i32) -> (i32, i32) {
    %c0_i32 = arith.constant 0 : i32
    %c0_i32_0 = arith.constant 0 : i32
    %c0_i32_1 = arith.constant 0 : i32
    return %c0_i32, %c0_i32_0 : i32, i32
  }
  func.func @transform_4(%arg0: i32, %arg1: i32) -> (i32, i32, i32) {
    %c0_i32 = arith.constant 0 : i32
    %c0_i32_0 = arith.constant 0 : i32
    return %arg1, %arg0, %c0_i32 : i32, i32, i32
  }
  func.func @transform_5(%arg0: i32, %arg1: i32) -> (i32, i32, i32) {
    %c0_i32 = arith.constant 0 : i32
    %0 = arith.subi %c0_i32, %arg1 : i32
    %c0_i32_0 = arith.constant 0 : i32
    %c0_i32_1 = arith.constant 0 : i32
    return %0, %arg0, %c0_i32_0 : i32, i32, i32
  }
}

module attributes {stable_mosaic.version = 11 : i64} {
  func.func @_input_proj_kernel(%arg0: i32, %arg1: memref<16x32xbf16, #tpu.memory_space<vmem>>, %arg2: memref<16x32xbf16, #tpu.memory_space<vmem>>, %arg3: memref<32x128xbf16, #tpu.memory_space<vmem>>, %arg4: memref<32x128xbf16, #tpu.memory_space<vmem>>, %arg5: memref<32x128xbf16, #tpu.memory_space<vmem>>, %arg6: memref<32x128xbf16, #tpu.memory_space<vmem>>, %arg7: memref<1x128xf32, #tpu.memory_space<vmem>>, %arg8: memref<1x128xf32, #tpu.memory_space<vmem>>, %arg9: memref<16x128xbf16, #tpu.memory_space<vmem>>, %arg10: memref<16x128xbf16, #tpu.memory_space<vmem>>) attributes {dimension_semantics = [#tpu.dimension_semantics<parallel>], iteration_bounds = array<i64: 1>, scalar_prefetch = 0 : i64, scratch_operands = 0 : i64, tpu.core_type = #tpu.core_type<tc>, window_params = [{transform_indices = @transform_0, window_bounds = array<i64: 16, 32>}, {transform_indices = @transform_1, window_bounds = array<i64: 16, 32>}, {pipeline_mode = #tpu.pipeline_mode<synchronous>, transform_indices = @transform_2, window_bounds = array<i64: 32, 128>}, {pipeline_mode = #tpu.pipeline_mode<synchronous>, transform_indices = @transform_3, window_bounds = array<i64: 32, 128>}, {pipeline_mode = #tpu.pipeline_mode<synchronous>, transform_indices = @transform_4, window_bounds = array<i64: 32, 128>}, {pipeline_mode = #tpu.pipeline_mode<synchronous>, transform_indices = @transform_5, window_bounds = array<i64: 32, 128>}, {pipeline_mode = #tpu.pipeline_mode<synchronous>, transform_indices = @transform_6, window_bounds = array<i64: 1, 128>}, {pipeline_mode = #tpu.pipeline_mode<synchronous>, transform_indices = @transform_7, window_bounds = array<i64: 1, 128>}, {transform_indices = @transform_8, window_bounds = array<i64: 16, 128>}, {transform_indices = @transform_9, window_bounds = array<i64: 16, 128>}]} {
    %c0 = arith.constant 0 : index
    %c0_0 = arith.constant 0 : index
    %0 = vector.load %arg7[%c0, %c0_0] : memref<1x128xf32, #tpu.memory_space<vmem>>, vector<1x128xf32>
    %c0_1 = arith.constant 0 : index
    %c0_2 = arith.constant 0 : index
    %1 = vector.load %arg8[%c0_1, %c0_2] : memref<1x128xf32, #tpu.memory_space<vmem>>, vector<1x128xf32>
    %c0_3 = arith.constant 0 : index
    %c0_4 = arith.constant 0 : index
    %2 = vector.load %arg1[%c0_3, %c0_4] : memref<16x32xbf16, #tpu.memory_space<vmem>>, vector<16x32xbf16>
    %c0_5 = arith.constant 0 : index
    %c0_6 = arith.constant 0 : index
    %3 = vector.load %arg3[%c0_5, %c0_6] : memref<32x128xbf16, #tpu.memory_space<vmem>>, vector<32x128xbf16>
    %cst = arith.constant dense<0.000000e+00> : vector<16x128xf32>
    %4 = tpu.matmul %2, %3, %cst {dimension_numbers = #tpu.dot_dimension_numbers<[1], [0], [0], [1], [0, 0, 1, 1], [], []>} : vector<16x32xbf16>, vector<32x128xbf16>, vector<16x128xf32> -> vector<16x128xf32>
    %5 = vector.broadcast %0 : vector<1x128xf32> to vector<16x128xf32>
    %6 = arith.addf %5, %4 : vector<16x128xf32>
    %c0_7 = arith.constant 0 : index
    %c0_8 = arith.constant 0 : index
    %7 = vector.load %arg5[%c0_7, %c0_8] : memref<32x128xbf16, #tpu.memory_space<vmem>>, vector<32x128xbf16>
    %cst_9 = arith.constant dense<0.000000e+00> : vector<16x128xf32>
    %8 = tpu.matmul %2, %7, %cst_9 {dimension_numbers = #tpu.dot_dimension_numbers<[1], [0], [0], [1], [0, 0, 1, 1], [], []>} : vector<16x32xbf16>, vector<32x128xbf16>, vector<16x128xf32> -> vector<16x128xf32>
    %9 = vector.broadcast %1 : vector<1x128xf32> to vector<16x128xf32>
    %10 = arith.addf %9, %8 : vector<16x128xf32>
    %c0_10 = arith.constant 0 : index
    %c0_11 = arith.constant 0 : index
    %11 = vector.load %arg2[%c0_10, %c0_11] : memref<16x32xbf16, #tpu.memory_space<vmem>>, vector<16x32xbf16>
    %c0_12 = arith.constant 0 : index
    %c0_13 = arith.constant 0 : index
    %12 = vector.load %arg4[%c0_12, %c0_13] : memref<32x128xbf16, #tpu.memory_space<vmem>>, vector<32x128xbf16>
    %cst_14 = arith.constant dense<0.000000e+00> : vector<16x128xf32>
    %13 = tpu.matmul %11, %12, %cst_14 {dimension_numbers = #tpu.dot_dimension_numbers<[1], [0], [0], [1], [0, 0, 1, 1], [], []>} : vector<16x32xbf16>, vector<32x128xbf16>, vector<16x128xf32> -> vector<16x128xf32>
    %14 = arith.addf %6, %13 : vector<16x128xf32>
    %c0_15 = arith.constant 0 : index
    %c0_16 = arith.constant 0 : index
    %15 = vector.load %arg6[%c0_15, %c0_16] : memref<32x128xbf16, #tpu.memory_space<vmem>>, vector<32x128xbf16>
    %cst_17 = arith.constant dense<0.000000e+00> : vector<16x128xf32>
    %16 = tpu.matmul %11, %15, %cst_17 {dimension_numbers = #tpu.dot_dimension_numbers<[1], [0], [0], [1], [0, 0, 1, 1], [], []>} : vector<16x32xbf16>, vector<32x128xbf16>, vector<16x128xf32> -> vector<16x128xf32>
    %17 = arith.addf %10, %16 : vector<16x128xf32>
    %18 = arith.truncf %14 : vector<16x128xf32> to vector<16x128xbf16>
    %c0_18 = arith.constant 0 : index
    %c0_19 = arith.constant 0 : index
    %19 = vector.load %arg9[%c0_18, %c0_19] : memref<16x128xbf16, #tpu.memory_space<vmem>>, vector<16x128xbf16>
    tpu.vector_store %arg9[%c0_18, %c0_19], %18 {strides = array<i32>} : memref<16x128xbf16, #tpu.memory_space<vmem>>, vector<16x128xbf16>,
    %20 = arith.truncf %17 : vector<16x128xf32> to vector<16x128xbf16>
    %c0_20 = arith.constant 0 : index
    %c0_21 = arith.constant 0 : index
    %21 = vector.load %arg10[%c0_20, %c0_21] : memref<16x128xbf16, #tpu.memory_space<vmem>>, vector<16x128xbf16>
    tpu.vector_store %arg10[%c0_20, %c0_21], %20 {strides = array<i32>} : memref<16x128xbf16, #tpu.memory_space<vmem>>, vector<16x128xbf16>,
    return
  }
  func.func @transform_0(%arg0: i32) -> (i32, i32) {
    %c0_i32 = arith.constant 0 : i32
    %c0_i32_0 = arith.constant 0 : i32
    return %arg0, %c0_i32 : i32, i32
  }
  func.func @transform_1(%arg0: i32) -> (i32, i32) {
    %c0_i32 = arith.constant 0 : i32
    %c0_i32_0 = arith.constant 0 : i32
    return %arg0, %c0_i32 : i32, i32
  }
  func.func @transform_2(%arg0: i32) -> (i32, i32) {
    %c0_i32 = arith.constant 0 : i32
    %c0_i32_0 = arith.constant 0 : i32
    %c0_i32_1 = arith.constant 0 : i32
    return %c0_i32, %c0_i32_0 : i32, i32
  }
  func.func @transform_3(%arg0: i32) -> (i32, i32) {
    %c0_i32 = arith.constant 0 : i32
    %c0_i32_0 = arith.constant 0 : i32
    %c0_i32_1 = arith.constant 0 : i32
    return %c0_i32, %c0_i32_0 : i32, i32
  }
  func.func @transform_4(%arg0: i32) -> (i32, i32) {
    %c0_i32 = arith.constant 0 : i32
    %c0_i32_0 = arith.constant 0 : i32
    %c0_i32_1 = arith.constant 0 : i32
    return %c0_i32, %c0_i32_0 : i32, i32
  }
  func.func @transform_5(%arg0: i32) -> (i32, i32) {
    %c0_i32 = arith.constant 0 : i32
    %c0_i32_0 = arith.constant 0 : i32
    %c0_i32_1 = arith.constant 0 : i32
    return %c0_i32, %c0_i32_0 : i32, i32
  }
  func.func @transform_6(%arg0: i32) -> (i32, i32) {
    %c0_i32 = arith.constant 0 : i32
    %c0_i32_0 = arith.constant 0 : i32
    %c0_i32_1 = arith.constant 0 : i32
    return %c0_i32, %c0_i32_0 : i32, i32
  }
  func.func @transform_7(%arg0: i32) -> (i32, i32) {
    %c0_i32 = arith.constant 0 : i32
    %c0_i32_0 = arith.constant 0 : i32
    %c0_i32_1 = arith.constant 0 : i32
    return %c0_i32, %c0_i32_0 : i32, i32
  }
  func.func @transform_8(%arg0: i32) -> (i32, i32) {
    %c0_i32 = arith.constant 0 : i32
    %c0_i32_0 = arith.constant 0 : i32
    return %arg0, %c0_i32 : i32, i32
  }
  func.func @transform_9(%arg0: i32) -> (i32, i32) {
    %c0_i32 = arith.constant 0 : i32
    %c0_i32_0 = arith.constant 0 : i32
    return %arg0, %c0_i32 : i32, i32
  }
}

module attributes {stable_mosaic.version = 11 : i64} {
  func.func @_attn_pool_kernel(%arg0: i32, %arg1: i32, %arg2: memref<8x2x32xbf16, #tpu.memory_space<vmem>>, %arg3: memref<8x2x32xbf16, #tpu.memory_space<vmem>>, %arg4: memref<8x2xf32, #tpu.memory_space<vmem>>, %arg5: memref<1x32xf32, #tpu.memory_space<vmem>>, %arg6: memref<1x32xf32, #tpu.memory_space<vmem>>, %arg7: memref<1x1xf32, #tpu.memory_space<vmem>>, %arg8: memref<1x32xf32, #tpu.memory_space<vmem>>, %arg9: memref<1x32xf32, #tpu.memory_space<vmem>>, %arg10: memref<1x1xf32, #tpu.memory_space<vmem>>, %arg11: memref<2x1xf32, #tpu.memory_space<vmem>>, %arg12: memref<1x2xf32, #tpu.memory_space<vmem>>, %arg13: memref<1x2xf32, #tpu.memory_space<vmem>>, %arg14: memref<2x32xf32, #tpu.memory_space<vmem>>, %arg15: memref<2x32xf32, #tpu.memory_space<vmem>>) attributes {dimension_semantics = [#tpu.dimension_semantics<parallel>, #tpu.dimension_semantics<arbitrary>], iteration_bounds = array<i64: 1, 1>, scalar_prefetch = 0 : i64, scratch_operands = 4 : i64, tpu.core_type = #tpu.core_type<tc>, window_params = [{transform_indices = @transform_0, window_bounds = array<i64: 8, 2, 32>}, {transform_indices = @transform_1, window_bounds = array<i64: 8, 2, 32>}, {transform_indices = @transform_2, window_bounds = array<i64: 8, 2>}, {pipeline_mode = #tpu.pipeline_mode<synchronous>, transform_indices = @transform_3, window_bounds = array<i64: 1, 32>}, {pipeline_mode = #tpu.pipeline_mode<synchronous>, transform_indices = @transform_4, window_bounds = array<i64: 1, 32>}, {pipeline_mode = #tpu.pipeline_mode<synchronous>, transform_indices = @transform_5, window_bounds = array<i64: 1, 1>}, {pipeline_mode = #tpu.pipeline_mode<synchronous>, transform_indices = @transform_6, window_bounds = array<i64: 1, 32>}, {pipeline_mode = #tpu.pipeline_mode<synchronous>, transform_indices = @transform_7, window_bounds = array<i64: 1, 32>}, {pipeline_mode = #tpu.pipeline_mode<synchronous>, transform_indices = @transform_8, window_bounds = array<i64: 1, 1>}, {transform_indices = @transform_9, window_bounds = array<i64: 2, 1>}]} {
    %c0_i32 = arith.constant 0 : i32
    %0 = arith.cmpi eq, %arg1, %c0_i32 : i32
    %1 = arith.extui %0 : i1 to i32
    %c0_i32_0 = arith.constant 0 : i32
    %2 = arith.cmpi ne, %1, %c0_i32_0 : i32
    scf.if %2 {
      %cst_39 = arith.constant 0xFF800000 : f32
      %64 = vector.broadcast %cst_39 : f32 to vector<1x2xf32>
      %c0_40 = arith.constant 0 : index
      %c0_41 = arith.constant 0 : index
      %65 = vector.load %arg12[%c0_40, %c0_41] : memref<1x2xf32, #tpu.memory_space<vmem>>, vector<1x2xf32>
      tpu.vector_store %arg12[%c0_40, %c0_41], %64 {strides = array<i32>} : memref<1x2xf32, #tpu.memory_space<vmem>>, vector<1x2xf32>,
      %cst_42 = arith.constant 0.000000e+00 : f32
      %66 = vector.broadcast %cst_42 : f32 to vector<1x2xf32>
      %c0_43 = arith.constant 0 : index
      %c0_44 = arith.constant 0 : index
      %67 = vector.load %arg13[%c0_43, %c0_44] : memref<1x2xf32, #tpu.memory_space<vmem>>, vector<1x2xf32>
      tpu.vector_store %arg13[%c0_43, %c0_44], %66 {strides = array<i32>} : memref<1x2xf32, #tpu.memory_space<vmem>>, vector<1x2xf32>,
      %cst_45 = arith.constant 0.000000e+00 : f32
      %68 = vector.broadcast %cst_45 : f32 to vector<2x32xf32>
      %c0_46 = arith.constant 0 : index
      %c0_47 = arith.constant 0 : index
      %69 = vector.load %arg14[%c0_46, %c0_47] : memref<2x32xf32, #tpu.memory_space<vmem>>, vector<2x32xf32>
      tpu.vector_store %arg14[%c0_46, %c0_47], %68 {strides = array<i32>} : memref<2x32xf32, #tpu.memory_space<vmem>>, vector<2x32xf32>,
      %cst_48 = arith.constant 0.000000e+00 : f32
      %70 = vector.broadcast %cst_48 : f32 to vector<2x32xf32>
      %c0_49 = arith.constant 0 : index
      %c0_50 = arith.constant 0 : index
      %71 = vector.load %arg15[%c0_49, %c0_50] : memref<2x32xf32, #tpu.memory_space<vmem>>, vector<2x32xf32>
      tpu.vector_store %arg15[%c0_49, %c0_50], %70 {strides = array<i32>} : memref<2x32xf32, #tpu.memory_space<vmem>>, vector<2x32xf32>,
    } else {
    }
    %c0 = arith.constant 0 : index
    %c0_1 = arith.constant 0 : index
    %c0_2 = arith.constant 0 : index
    %3 = vector.load %arg2[%c0, %c0_1, %c0_2] : memref<8x2x32xbf16, #tpu.memory_space<vmem>>, vector<8x2x32xbf16>
    %4 = arith.extf %3 : vector<8x2x32xbf16> to vector<8x2x32xf32>
    %c0_3 = arith.constant 0 : index
    %c0_4 = arith.constant 0 : index
    %c0_5 = arith.constant 0 : index
    %5 = vector.load %arg3[%c0_3, %c0_4, %c0_5] : memref<8x2x32xbf16, #tpu.memory_space<vmem>>, vector<8x2x32xbf16>
    %6 = arith.extf %5 : vector<8x2x32xbf16> to vector<8x2x32xf32>
    %c0_6 = arith.constant 0 : index
    %c0_7 = arith.constant 0 : index
    %7 = vector.load %arg5[%c0_6, %c0_7] : memref<1x32xf32, #tpu.memory_space<vmem>>, vector<1x32xf32>
    %8 = vector.shape_cast %7 : vector<1x32xf32> to vector<1x1x32xf32>
    %9 = vector.broadcast %8 : vector<1x1x32xf32> to vector<8x2x32xf32>
    %10 = arith.mulf %4, %9 : vector<8x2x32xf32>
    %cst = arith.constant dense<0.000000e+00> : vector<8x2xf32>
    %11 = vector.multi_reduction <add>, %10, %cst [2] : vector<8x2x32xf32> to vector<8x2xf32>
    %c0_8 = arith.constant 0 : index
    %c0_9 = arith.constant 0 : index
    %12 = vector.load %arg6[%c0_8, %c0_9] : memref<1x32xf32, #tpu.memory_space<vmem>>, vector<1x32xf32>
    %13 = vector.shape_cast %12 : vector<1x32xf32> to vector<1x1x32xf32>
    %14 = vector.broadcast %13 : vector<1x1x32xf32> to vector<8x2x32xf32>
    %15 = arith.mulf %6, %14 : vector<8x2x32xf32>
    %cst_10 = arith.constant dense<0.000000e+00> : vector<8x2xf32>
    %16 = vector.multi_reduction <add>, %15, %cst_10 [2] : vector<8x2x32xf32> to vector<8x2xf32>
    %17 = arith.addf %11, %16 : vector<8x2xf32>
    %c0_11 = arith.constant 0 : index
    %c0_12 = arith.constant 0 : index
    %18 = vector.load %arg7[%c0_11, %c0_12] : memref<1x1xf32, #tpu.memory_space<vmem>>, vector<1x1xf32>
    %19 = vector.broadcast %18 : vector<1x1xf32> to vector<8x2xf32>
    %20 = arith.addf %17, %19 : vector<8x2xf32>
    %c0_13 = arith.constant 0 : index
    %c0_14 = arith.constant 0 : index
    %21 = vector.load %arg4[%c0_13, %c0_14] : memref<8x2xf32, #tpu.memory_space<vmem>>, vector<8x2xf32>
    %cst_15 = arith.constant 0.000000e+00 : f32
    %22 = vector.broadcast %cst_15 : f32 to vector<8x2xf32>
    %23 = arith.cmpf oeq, %21, %22 : vector<8x2xf32>
    %cst_16 = arith.constant -1.000000e+09 : f32
    %24 = vector.broadcast %cst_16 : f32 to vector<8x2xf32>
    %25 = arith.select %23, %24, %20 : vector<8x2xi1>, vector<8x2xf32>
    %c0_17 = arith.constant 0 : index
    %c0_18 = arith.constant 0 : index
    %26 = vector.load %arg12[%c0_17, %c0_18] : memref<1x2xf32, #tpu.memory_space<vmem>>, vector<1x2xf32>
    %cst_19 = arith.constant dense<0xFF800000> : vector<2xf32>
    %27 = vector.multi_reduction <maximumf>, %25, %cst_19 [0] : vector<8x2xf32> to vector<2xf32>
    %28 = vector.shape_cast %27 : vector<2xf32> to vector<1x2xf32>
    %29 = arith.maximumf %26, %28 : vector<1x2xf32>
    %30 = arith.subf %26, %29 : vector<1x2xf32>
    %31 = math.exp %30 : vector<1x2xf32>
    %32 = vector.broadcast %29 : vector<1x2xf32> to vector<8x2xf32>
    %33 = arith.subf %25, %32 : vector<8x2xf32>
    %34 = math.exp %33 : vector<8x2xf32>
    %35 = tpu.transpose %31, [1, 0] : vector<1x2xf32> -> vector<2x1xf32>
    %c0_20 = arith.constant 0 : index
    %c0_21 = arith.constant 0 : index
    %36 = vector.load %arg13[%c0_20, %c0_21] : memref<1x2xf32, #tpu.memory_space<vmem>>, vector<1x2xf32>
    %37 = arith.mulf %31, %36 : vector<1x2xf32>
    %cst_22 = arith.constant dense<0.000000e+00> : vector<2xf32>
    %38 = vector.multi_reduction <add>, %34, %cst_22 [0] : vector<8x2xf32> to vector<2xf32>
    %39 = vector.shape_cast %38 : vector<2xf32> to vector<1x2xf32>
    %40 = arith.addf %37, %39 : vector<1x2xf32>
    %c0_23 = arith.constant 0 : index
    %c0_24 = arith.constant 0 : index
    %41 = vector.load %arg13[%c0_23, %c0_24] : memref<1x2xf32, #tpu.memory_space<vmem>>, vector<1x2xf32>
    tpu.vector_store %arg13[%c0_23, %c0_24], %40 {strides = array<i32>} : memref<1x2xf32, #tpu.memory_space<vmem>>, vector<1x2xf32>,
    %c0_25 = arith.constant 0 : index
    %c0_26 = arith.constant 0 : index
    %42 = vector.load %arg14[%c0_25, %c0_26] : memref<2x32xf32, #tpu.memory_space<vmem>>, vector<2x32xf32>
    %43 = vector.broadcast %35 : vector<2x1xf32> to vector<2x32xf32>
    %44 = arith.mulf %43, %42 : vector<2x32xf32>
    %45 = vector.shape_cast %34 : vector<8x2xf32> to vector<8x2x1xf32>
    %46 = vector.broadcast %45 : vector<8x2x1xf32> to vector<8x2x32xf32>
    %47 = arith.mulf %46, %4 : vector<8x2x32xf32>
    %cst_27 = arith.constant dense<0.000000e+00> : vector<2x32xf32>
    %48 = vector.multi_reduction <add>, %47, %cst_27 [0] : vector<8x2x32xf32> to vector<2x32xf32>
    %49 = arith.addf %44, %48 : vector<2x32xf32>
    %c0_28 = arith.constant 0 : index
    %c0_29 = arith.constant 0 : index
    %50 = vector.load %arg14[%c0_28, %c0_29] : memref<2x32xf32, #tpu.memory_space<vmem>>, vector<2x32xf32>
    tpu.vector_store %arg14[%c0_28, %c0_29], %49 {strides = array<i32>} : memref<2x32xf32, #tpu.memory_space<vmem>>, vector<2x32xf32>,
    %c0_30 = arith.constant 0 : index
    %c0_31 = arith.constant 0 : index
    %51 = vector.load %arg15[%c0_30, %c0_31] : memref<2x32xf32, #tpu.memory_space<vmem>>, vector<2x32xf32>
    %52 = vector.broadcast %35 : vector<2x1xf32> to vector<2x32xf32>
    %53 = arith.mulf %52, %51 : vector<2x32xf32>
    %54 = vector.shape_cast %34 : vector<8x2xf32> to vector<8x2x1xf32>
    %55 = vector.broadcast %54 : vector<8x2x1xf32> to vector<8x2x32xf32>
    %56 = arith.mulf %55, %6 : vector<8x2x32xf32>
    %cst_32 = arith.constant dense<0.000000e+00> : vector<2x32xf32>
    %57 = vector.multi_reduction <add>, %56, %cst_32 [0] : vector<8x2x32xf32> to vector<2x32xf32>
    %58 = arith.addf %53, %57 : vector<2x32xf32>
    %c0_33 = arith.constant 0 : index
    %c0_34 = arith.constant 0 : index
    %59 = vector.load %arg15[%c0_33, %c0_34] : memref<2x32xf32, #tpu.memory_space<vmem>>, vector<2x32xf32>
    tpu.vector_store %arg15[%c0_33, %c0_34], %58 {strides = array<i32>} : memref<2x32xf32, #tpu.memory_space<vmem>>, vector<2x32xf32>,
    %c0_35 = arith.constant 0 : index
    %c0_36 = arith.constant 0 : index
    %60 = vector.load %arg12[%c0_35, %c0_36] : memref<1x2xf32, #tpu.memory_space<vmem>>, vector<1x2xf32>
    tpu.vector_store %arg12[%c0_35, %c0_36], %29 {strides = array<i32>} : memref<1x2xf32, #tpu.memory_space<vmem>>, vector<1x2xf32>,
    %c0_i32_37 = arith.constant 0 : i32
    %61 = arith.cmpi eq, %arg1, %c0_i32_37 : i32
    %62 = arith.extui %61 : i1 to i32
    %c0_i32_38 = arith.constant 0 : i32
    %63 = arith.cmpi ne, %62, %c0_i32_38 : i32
    scf.if %63 {
      %c0_39 = arith.constant 0 : index
      %c0_40 = arith.constant 0 : index
      %64 = vector.load %arg13[%c0_39, %c0_40] : memref<1x2xf32, #tpu.memory_space<vmem>>, vector<1x2xf32>
      %cst_41 = arith.constant 1.000000e+00 : f32
      %65 = vector.broadcast %cst_41 : f32 to vector<1x2xf32>
      %66 = arith.divf %65, %64 : vector<1x2xf32>
      %67 = tpu.transpose %66, [1, 0] : vector<1x2xf32> -> vector<2x1xf32>
      %c0_42 = arith.constant 0 : index
      %c0_43 = arith.constant 0 : index
      %68 = vector.load %arg14[%c0_42, %c0_43] : memref<2x32xf32, #tpu.memory_space<vmem>>, vector<2x32xf32>
      %69 = vector.broadcast %67 : vector<2x1xf32> to vector<2x32xf32>
      %70 = arith.mulf %68, %69 : vector<2x32xf32>
      %c0_44 = arith.constant 0 : index
      %c0_45 = arith.constant 0 : index
      %71 = vector.load %arg15[%c0_44, %c0_45] : memref<2x32xf32, #tpu.memory_space<vmem>>, vector<2x32xf32>
      %72 = vector.broadcast %67 : vector<2x1xf32> to vector<2x32xf32>
      %73 = arith.mulf %71, %72 : vector<2x32xf32>
      %c0_46 = arith.constant 0 : index
      %c0_47 = arith.constant 0 : index
      %74 = vector.load %arg8[%c0_46, %c0_47] : memref<1x32xf32, #tpu.memory_space<vmem>>, vector<1x32xf32>
      %75 = vector.broadcast %74 : vector<1x32xf32> to vector<2x32xf32>
      %76 = arith.mulf %70, %75 : vector<2x32xf32>
      %cst_48 = arith.constant dense<0.000000e+00> : vector<2xf32>
      %77 = vector.multi_reduction <add>, %76, %cst_48 [1] : vector<2x32xf32> to vector<2xf32>
      %78 = vector.shape_cast %77 : vector<2xf32> to vector<2x1xf32>
      %c0_49 = arith.constant 0 : index
      %c0_50 = arith.constant 0 : index
      %79 = vector.load %arg9[%c0_49, %c0_50] : memref<1x32xf32, #tpu.memory_space<vmem>>, vector<1x32xf32>
      %80 = vector.broadcast %79 : vector<1x32xf32> to vector<2x32xf32>
      %81 = arith.mulf %73, %80 : vector<2x32xf32>
      %cst_51 = arith.constant dense<0.000000e+00> : vector<2xf32>
      %82 = vector.multi_reduction <add>, %81, %cst_51 [1] : vector<2x32xf32> to vector<2xf32>
      %83 = vector.shape_cast %82 : vector<2xf32> to vector<2x1xf32>
      %84 = arith.addf %78, %83 : vector<2x1xf32>
      %c0_52 = arith.constant 0 : index
      %c0_53 = arith.constant 0 : index
      %85 = vector.load %arg10[%c0_52, %c0_53] : memref<1x1xf32, #tpu.memory_space<vmem>>, vector<1x1xf32>
      %86 = vector.broadcast %85 : vector<1x1xf32> to vector<2x1xf32>
      %87 = arith.addf %84, %86 : vector<2x1xf32>
      %c0_54 = arith.constant 0 : index
      %c0_55 = arith.constant 0 : index
      %88 = vector.load %arg11[%c0_54, %c0_55] : memref<2x1xf32, #tpu.memory_space<vmem>>, vector<2x1xf32>
      tpu.vector_store %arg11[%c0_54, %c0_55], %87 {strides = array<i32>} : memref<2x1xf32, #tpu.memory_space<vmem>>, vector<2x1xf32>,
    } else {
    }
    return
  }
  func.func @transform_0(%arg0: i32, %arg1: i32) -> (i32, i32, i32) {
    %c0_i32 = arith.constant 0 : i32
    %c0_i32_0 = arith.constant 0 : i32
    return %arg1, %arg0, %c0_i32 : i32, i32, i32
  }
  func.func @transform_1(%arg0: i32, %arg1: i32) -> (i32, i32, i32) {
    %c0_i32 = arith.constant 0 : i32
    %c0_i32_0 = arith.constant 0 : i32
    return %arg1, %arg0, %c0_i32 : i32, i32, i32
  }
  func.func @transform_2(%arg0: i32, %arg1: i32) -> (i32, i32) {
    %c0_i32 = arith.constant 0 : i32
    return %arg1, %arg0 : i32, i32
  }
  func.func @transform_3(%arg0: i32, %arg1: i32) -> (i32, i32) {
    %c0_i32 = arith.constant 0 : i32
    %c0_i32_0 = arith.constant 0 : i32
    %c0_i32_1 = arith.constant 0 : i32
    return %c0_i32, %c0_i32_0 : i32, i32
  }
  func.func @transform_4(%arg0: i32, %arg1: i32) -> (i32, i32) {
    %c0_i32 = arith.constant 0 : i32
    %c0_i32_0 = arith.constant 0 : i32
    %c0_i32_1 = arith.constant 0 : i32
    return %c0_i32, %c0_i32_0 : i32, i32
  }
  func.func @transform_5(%arg0: i32, %arg1: i32) -> (i32, i32) {
    %c0_i32 = arith.constant 0 : i32
    %c0_i32_0 = arith.constant 0 : i32
    %c0_i32_1 = arith.constant 0 : i32
    return %c0_i32, %c0_i32_0 : i32, i32
  }
  func.func @transform_6(%arg0: i32, %arg1: i32) -> (i32, i32) {
    %c0_i32 = arith.constant 0 : i32
    %c0_i32_0 = arith.constant 0 : i32
    %c0_i32_1 = arith.constant 0 : i32
    return %c0_i32, %c0_i32_0 : i32, i32
  }
  func.func @transform_7(%arg0: i32, %arg1: i32) -> (i32, i32) {
    %c0_i32 = arith.constant 0 : i32
    %c0_i32_0 = arith.constant 0 : i32
    %c0_i32_1 = arith.constant 0 : i32
    return %c0_i32, %c0_i32_0 : i32, i32
  }
  func.func @transform_8(%arg0: i32, %arg1: i32) -> (i32, i32) {
    %c0_i32 = arith.constant 0 : i32
    %c0_i32_0 = arith.constant 0 : i32
    %c0_i32_1 = arith.constant 0 : i32
    return %c0_i32, %c0_i32_0 : i32, i32
  }
  func.func @transform_9(%arg0: i32, %arg1: i32) -> (i32, i32) {
    %c0_i32 = arith.constant 0 : i32
    %c0_i32_0 = arith.constant 0 : i32
    return %arg0, %c0_i32 : i32, i32
  }
}

</mosaic_0001>

<bundles_post_ra>
// kernel: bilstm_with_attention.5
= control target key start
LH: loop header
LB: loop body
LE: loop exit
PB: predicated region body
PF: predicated region fallthrough
CT: control target
= control target key end

     0   :  { %vm48_vm0 = vcmask 261120   ;;  %s223_s1 = inlined_call_operand.vmem [shape: bf16[32,128], index: 1, kind: input, shape index: {}]   ;;  %s224_s2 = inlined_call_operand.vmem [shape: bf16[32,128], index: 2, kind: input, shape index: {}]   ;;  %s225_s3 = inlined_call_operand.vmem [shape: f32[1,128], index: 3, kind: input, shape index: {}]   ;;  %s226_s0 = inlined_call_operand.vmem [shape: bf16[16,32], index: 0, kind: input, shape index: {}]   ;;  %s227_s4 = inlined_call_operand.vmem [shape: f32[1,128], index: 4, kind: input, shape index: {}]   ;;  %s228_s5 = inlined_call_operand.vmem [shape: bf16[16,128], index: 5, kind: output, shape index: {0}]   ;;  %s229_s6 = inlined_call_operand.vmem [shape: bf16[16,128], index: 6, kind: output, shape index: {1}]  }
   0x1   :  { %v146_v0 = vld [vmem:[%s223_s1 + $0x8] sm:$0xff]  ;;  %v145_v2 = vld [vmem:[%s223_s1] sm:$0xff] }
   0x2   :  { %v148_v1 = vld [vmem:[%s224_s2 + $0x8] sm:$0xff]  ;;  %58 = vmatpush.bf16.msra.mxu0 %v146_v0  ;;  %v147_v3 = vld [vmem:[%s224_s2] sm:$0xff] }
   0x3   :  { %93 = vmatpush.bf16.msra.mxu1 %v148_v1  ;;  %v144_v4 = vld [vmem:[%s226_s0] sm:$0xff] }
   0x4   :  { %v159_v7 = vld [vmem:[%s225_s3] ss:$0 sm:$0xff] }
   0x5   :  { %v160_v8 = vld [vmem:[%s227_s4] ss:$0 sm:$0xff] }
   0x6   :  { %59 = vmatpush.bf16.msra.mxu0 %v145_v2 }
   0x7   :  { %94 = vmatpush.bf16.msra.mxu1 %v147_v3 }
   0x9   :  { %134 = vmatmul.msk.bf16.vlgmr.msra.gmra.mxu0 %vm48_vm0, %v144_v4 }
   0xa   :  { %143 = vmatmul.msk.bf16.vlgmr.msra.gmra.mxu1 %vm48_vm0, %v144_v4 }
  0x86   :  { %v61_v5 = vpop.f32.mrf.mxu0 }
  0x87   :  { %v96_v6 = vpop.f32.mrf.mxu1  ;;  %v69_v11 = vadd.f32 %v159_v7, %v61_v5 }
  0x88   :  { %v104_v12 = vadd.f32 %v160_v8, %v96_v6 }
  0x8e   :  { %v63_v9 = vpop.f32.mrf.mxu0 }
  0x8f   :  { %v98_v10 = vpop.f32.mrf.mxu1  ;;  %v70_v13 = vadd.f32 %v159_v7, %v63_v9 }
  0x90   :  { %v105_v14 = vadd.f32 %v160_v8, %v98_v10 }
  0x91   :  { %v152_v15 = vpack.c.bf16 %v70_v13, %v69_v11 }
  0x92   :  { %v157_v16 = vpack.c.bf16 %v105_v14, %v104_v12 }
  0x93   :  { %153 = vst [vmem:[%s228_s5] sm:$0xff] %v152_v15  }
  0x94   :  { %158 = vst [vmem:[%s229_s6] sm:$0xff] %v157_v16  }

// kernel: bilstm_with_attention.6
= control target key start
LH: loop header
LB: loop body
LE: loop exit
PB: predicated region body
PF: predicated region fallthrough
CT: control target
= control target key end

     0   :  { %11 = vsyncpa [#allocation7], 0  ;;  %s684_s0 = inlined_call_operand.vmem [shape: bf16[8,2,128], index: 0, kind: input, shape index: {}]   ;;  %s685_s1 = inlined_call_operand.vmem [shape: bf16[8,2,128], index: 1, kind: input, shape index: {}]   ;;  %s686_s2 = inlined_call_operand.hbm [shape: bf16[32,128], index: 2, kind: input, shape index: {}]   ;;  %s687_s3 = inlined_call_operand.hbm [shape: bf16[32,128], index: 3, kind: input, shape index: {}]   ;;  %s688_s4 = inlined_call_operand.vmem [shape: bf16[8,2,32], index: 4, kind: output, shape index: {0}]   ;;  %s689_s5 = inlined_call_operand.vmem [shape: bf16[8,2,32], index: 5, kind: output, shape index: {1}]  }
   0x1   :  { %s28_s20 = sshll.u32 %s686_s2, 4  ;;  %s29_s20 = int_to_ptr.hbm [resolvable:$true] %s28_s20 }
   0x2   :  { %12 = vsyncpa [#allocation9], 0  ;;  %s549_s21 = smov [#allocation6]   ;;  %s41_s25 = sshll.u32 %s687_s3, 4  ;;  %s42_s25 = int_to_ptr.hbm [resolvable:$true] %s41_s25 }
   0x3   :  { %s30_s22 = sshll.u32 %s549_s21, 4  ;;  %s550_s26 = smov 64   ;;  %s31_s22 = int_to_ptr.vmem [resolvable:$true] %s30_s22 }
   0x4   :  { %s551_s27 = smov 4   ;;  %s552_s28 = smov [#allocation8]  }
   0x5   :  { %36 = dma.hbm_to_vmem [thread:$0]  %s29_s20, 256, %s31_s22, [#allocation7], %s550_s26, %s550_s26, %s551_s27  }
   0x6   :  { %s43_s29 = sshll.u32 %s552_s28, 4  ;;  %s44_s29 = int_to_ptr.vmem [resolvable:$true] %s43_s29 }
   0x7   :  { %49 = dma.hbm_to_vmem [thread:$0]  %s42_s25, 256, %s44_s29, [#allocation9], %s550_s26, %s550_s26, %s551_s27  }
   0x8   :  { %525 = dma.done.wait [#allocation7], 256  }
   0x9   :  { %526 = vsyncadd [#allocation7], 4294967040 }
   0xa   :  { %527 = dma.done.wait [#allocation9], 256  }
   0xb   :  { %528 = vsyncadd [#allocation9], 4294967040  ;;  %vm87_vm0 = vcmask 254976   ;;  %v553_v0 = vmov 0.0   ;;  %v597_v1 = vld [vmem:[#allocation6] sm:$0xf] }
   0xc   :  { %88 = vst.msk [vmem:[#allocation2] sm:$0x3] %vm87_vm0, %v553_v0  ;;  %v599_v2 = vld [vmem:[#allocation6] sm:$0xf0]  ;;  %v601_v3 = vld [vmem:[#allocation6 + $0x8] sm:$0xf] }
   0xd   :  { %89 = vst.msk [vmem:[#allocation3] sm:$0x3] %vm87_vm0, %v553_v0  ;;  %v603_v4 = vld [vmem:[#allocation6 + $0x8] sm:$0xf0]  ;;  %v605_v5 = vld [vmem:[#allocation8] sm:$0xf] }
   0xe   :  { %90 = vst.msk [vmem:[#allocation4] sm:$0x3] %vm87_vm0, %v553_v0  ;;  %v607_v6 = vld [vmem:[#allocation8] sm:$0xf0]  ;;  %v609_v7 = vld [vmem:[#allocation8 + $0x8] sm:$0xf] }
   0xf   :  { %91 = vst.msk [vmem:[#allocation5] sm:$0x3] %vm87_vm0, %v553_v0  ;;  %v611_v8 = vld [vmem:[#allocation8 + $0x8] sm:$0xf0]  ;;  %s621_s2 = smov 0  }
  0x13   :  { %v100_v9 = vld [vmem:[#allocation2] sm:$0x3]  }
  0x14   :  { %v101_v10 = vld [vmem:[#allocation3] sm:$0x3]  }
  0x15   :  { %v102_v11 = vld [vmem:[#allocation4] sm:$0x3]  }
  0x16   :  { %v103_v12 = vld [vmem:[#allocation5] sm:$0x3]  }
  0x17 LB: > { %v376_v13 = vor.u32 %v603_v4, %v601_v3  ;;  %v386_v14 = vor.u32 %v611_v8, %v609_v7  ;;  %v372_v15 = vor.u32 %v599_v2, %v597_v1  ;;  %v382_v16 = vor.u32 %v607_v6, %v605_v5  ;;  %s554_s3 = smov 32   ;;  %s115_s7 = scalar_lea.vmem %s684_s0, %s547_s2  ;;  %s547_s2 = sphi %s621_s2, %s109_s2   ;;  %v543_v9 = vphi %v100_v9, %v693_v9   ;;  %v539_v10 = vphi %v101_v10, %v692_v10   ;;  %v535_v11 = vphi %v102_v11, %v691_v11   ;;  %v531_v12 = vphi %v103_v12, %v690_v12  }
  0x18   : > { %170 = vrot.lane.b32.xlu1 %v539_v10, %s554_s3  ;;  %258 = vrot.lane.b32.xlu2 %v531_v12, %s554_s3  ;;  %v118_v17 = vpack.c.bf16 %v543_v9, %v543_v9  ;;  %vm131_vm1 = vcmask 261120   ;;  %v207_v18 = vpack.c.bf16 %v535_v11, %v535_v11  ;;  %s114_s8 = ssub.s32 7, %s547_s2  ;;  %v116_v19 = vld [vmem:[%s115_s7] sm:$0x1]  ;;  %s555_s12 = smov 64   ;;  %vm193_vm10 = vcmask 1040384  }
  0x19   : > { %141 = vmatpush.bf16.msra.mxu0 %v376_v13  ;;  %229 = vmatpush.bf16.msra.mxu1 %v386_v14  ;;  %s204_s11 = scalar_lea.vmem %s685_s1, %s114_s8  ;;  %v117_v20 = vunpack.c.l.bf16 %v116_v19  ;;  %s556_s13 = smov 96   ;;  %vm202_vm11 = vcmask 253952  }
  0x1a   : > { %v205_v21 = vld [vmem:[%s204_s11] sm:$0x1]  ;;  %s201_s16 = scalar_lea.vmem %s688_s4, %s547_s2  ;;  %s288_s19 = scalar_lea.vmem %s689_s5, %s114_s8 }
  0x1b   : > { %v206_v24 = vunpack.c.l.bf16 %v205_v21  ;;  %s109_s2 = sadd.s32 1, %s547_s2  }
  0x1c   : > { %p106_p0 = scmp.ge.s32.totalorder %s109_s2, 8  }
  0x1d   : > { %142 = vmatpush.bf16.msra.mxu0 %v372_v15  ;;  %230 = vmatpush.bf16.msra.mxu1 %v382_v16 }
  0x20   : > { %377 = vmatmul.msk.bf16.vlgmr.msra.gmra.mxu0 %vm131_vm1, %v118_v17  ;;  %387 = vmatmul.msk.bf16.vlgmr.msra.gmra.mxu1 %vm131_vm1, %v207_v18 }
  0x72   : > { %v259_v61 = vpop.permute.xlu2 %258 }
  0x8a   : > { %v171_v9 = vpop.permute.xlu1 %170 }
  0x9d   : > { %v144_v22 = vpop.f32.mrf.mxu0  ;;  %v232_v25 = vpop.f32.mrf.mxu1 }
  0x9e   : > { %v148_v23 = vadd.f32 %v144_v22, %v117_v20  ;;  %v236_v26 = vadd.f32 %v232_v25, %v206_v24 }
  0xa0   : > { %441 = vtanh.f32 %v148_v23  ;;  %v378_v31 = vmul.f32 -1.442695, %v148_v23  ;;  %v388_v32 = vmul.f32 -1.442695, %v236_v26 }
  0xa1   : > { %443 = vtanh.f32 %v236_v26 }
  0xa2   : > { %445 = vpow2.f32 %v378_v31 }
  0xa3   : > { %447 = vpow2.f32 %v388_v32 }
  0xa5   : > { %v146_v27 = vpop.f32.mrf.mxu0  ;;  %v234_v29 = vpop.f32.mrf.mxu1 }
  0xa6   : > { %v442_v28 = vpop.eup %441 }
  0xa7   : > { %175 = vrot.lane.b32.xlu0 %v442_v28, %s555_s12  ;;  %v444_v30 = vpop.eup %443 }
  0xa8   : > { %v446_v33 = vpop.eup %445 }
  0xa9   : > { %v152_v34 = vadd.f32 1.0, %v446_v33  ;;  %v448_v35 = vpop.eup %447 }
  0xaa   : > { %v240_v36 = vadd.f32 1.0, %v448_v35 }
  0xab   : > { %449 = vrcp.f32 %v152_v34  ;;  %v164_v45 = vand.u32 2147483648, %v152_v34  ;;  %vm158_vm3 = vweird.f32 %v152_v34  ;;  %v162_v46 = vand.u32 2147483647, %v152_v34 }
  0xac   : > { %451 = vrcp.f32 %v240_v36  ;;  %vm246_vm6 = vweird.f32 %v240_v36  ;;  %v252_v51 = vand.u32 2147483648, %v240_v36  ;;  %v250_v54 = vand.u32 2147483647, %v240_v36 }
  0xad   : > { %v165_v49 = vor.u32 1.1754944e-38, %v164_v45  ;;  %vm163_vm5 = vcmp.eq.f32.partialorder %v162_v46, 8.507059e+37 }
  0xae   : > { %v253_v56 = vor.u32 1.1754944e-38, %v252_v51  ;;  %vm251_vm9 = vcmp.eq.f32.partialorder %v250_v54, 8.507059e+37 }
  0xaf   : > { %263 = vrot.lane.b32.xlu0 %v444_v30, %s555_s12 }
  0xb1   : > { %v450_v37 = vpop.eup %449 }
  0xb2   : > { %v154_v38 = vmul.f32 %v450_v37, %v152_v34  ;;  %v452_v40 = vpop.eup %451  ;;  %vm159_vm2 = vweird.f32 %v450_v37 }
  0xb3   : > { %v242_v42 = vmul.f32 %v452_v40, %v240_v36  ;;  %vm160_vm4 = vmor %vm158_vm3, %vm159_vm2  ;;  %vm247_vm7 = vweird.f32 %v452_v40 }
  0xb4   : > { %v155_v39 = vsub.f32 1.0, %v154_v38  ;;  %vm248_vm8 = vmor %vm246_vm6, %vm247_vm7 }
  0xb5   : > { %v243_v44 = vsub.f32 1.0, %v242_v42 }
  0xb6   : > { %v156_v41 = vmul.f32 %v450_v37, %v155_v39 }
  0xb7   : > { %v244_v48 = vmul.f32 %v452_v40, %v243_v44 }
  0xb8   : > { %v157_v43 = vadd.f32 %v450_v37, %v156_v41 }
  0xb9   : > { %v245_v53 = vadd.f32 %v452_v40, %v244_v48 }
  0xba   : > { %v161_v47 = vsel %vm160_vm4, %v450_v37, %v157_v43 }
  0xbb   : > { %v166_v50 = vsel %vm163_vm5, %v165_v49, %v161_v47  ;;  %v249_v57 = vsel %vm248_vm8, %v452_v40, %v245_v53 }
  0xbc   : > { %v254_v58 = vsel %vm251_vm9, %v253_v56, %v249_v57  ;;  %v173_v11 = vmul.f32 %v171_v9, %v166_v50 }
  0xbd   : > { %v261_v62 = vmul.f32 %v259_v61, %v254_v58 }
 0x119   : > { %v176_v52 = vpop.permute.xlu0 %175 }
 0x11a   : > { %v178_v55 = vmul.f32 %v176_v52, %v166_v50 }
 0x11c   : > { %180 = vrot.lane.b32.xlu1 %v178_v55, %s554_s3 }
 0x121   : > { %v264_v59 = vpop.permute.xlu0 %263 }
 0x122   : > { %v266_v60 = vmul.f32 %v264_v59, %v254_v58 }
 0x124   : > { %268 = vrot.lane.b32.xlu2 %v266_v60, %s554_s3 }
 0x17e   : > { %v269_v63 = vpop.permute.xlu2 %268 }
 0x17f   : > { %v271_v0 = vadd.f32 %v269_v63, %v261_v62 }
 0x181   : > { %453 = vtanh.f32 %v271_v0 }
 0x187   : > { %v454_v10 = vpop.eup %453 }
 0x188   : > { %274 = vrot.lane.b32.xlu1 %v454_v10, %s555_s12 }
 0x18e   : > { %v181_v12 = vpop.permute.xlu1 %180 }
 0x18f   : > { %v183_v13 = vadd.f32 %v181_v12, %v173_v11 }
 0x191   : > { %455 = vtanh.f32 %v183_v13 }
 0x197   : > { %v456_v14 = vpop.eup %455 }
 0x198   : > { %186 = vrot.lane.b32.xlu0 %v456_v14, %s555_s12 }
 0x1fa   : > { %v275_v15 = vpop.permute.xlu1 %274 }
 0x1fb   : > { %v277_v16 = vmul.f32 %v275_v15, %v254_v58 }
 0x1fd   : > { %v278_v17 = vpack.c.bf16 %v277_v16, %v277_v16 }
 0x1ff   : > { %v280_v18 = vrot.slane %v278_v17, 3 }
 0x201   : > { %v283_v19 = vsel %vm193_vm10, %v278_v17, %v280_v18 }
 0x202   : > { %285 = vrot.lane.b32.xlu0 %v283_v19, %s554_s3 }
 0x20a   : > { %v187_v20 = vpop.permute.xlu0 %186 }
 0x20b   : > { %v189_v21 = vmul.f32 %v187_v20, %v166_v50 }
 0x20d   : > { %v190_v22 = vpack.c.bf16 %v189_v21, %v189_v21  ;;  %291 = vst [vmem:[#allocation1] ss:$4 sm:$0xff] %v189_v21 }
 0x20f   : > { %v192_v23 = vrot.slane %v190_v22, 3 }
 0x211   : > { %v196_v24 = vsel %vm193_vm10, %v190_v22, %v192_v23 }
 0x212   : > { %198 = vrot.lane.b32.xlu2 %v196_v24, %s554_s3 }
 0x214   : > { %v292_v25 = vld.sshfl [vmem:[#allocation1] sm:$0xff pattern:$0x73625140] }
 0x215   : > { %297 = vst [vmem:[#allocation1] ss:$4 sm:$0xff] %v183_v13  ;;  %293 = vrot.lane.b32.xlu1 %v292_v25, %s554_s3 }
 0x21c   : > { %v298_v26 = vld.sshfl [vmem:[#allocation1] sm:$0xff pattern:$0x73625140] }
 0x21d   : > { %299 = vrot.lane.b32.xlu2 %v298_v26, %s556_s13  ;;  %303 = vst [vmem:[#allocation1] ss:$4 sm:$0xff] %v277_v16 }
 0x224   : > { %v304_v27 = vld.sshfl [vmem:[#allocation1] sm:$0xff pattern:$0x73625140] }
 0x225   : > { %309 = vst [vmem:[#allocation1] ss:$4 sm:$0xff] %v271_v0  ;;  %305 = vrot.lane.b32.xlu0 %v304_v27, %s554_s3 }
 0x22c   : > { %v310_v28 = vld.sshfl [vmem:[#allocation1] sm:$0xff pattern:$0x73625140] }
 0x22d   : > { %311 = vrot.lane.b32.xlu1 %v310_v28, %s556_s13 }
 0x26c   : > { %v199_v29 = vpop.permute.xlu2 %198 }
 0x26d   : > { %203 = vst.msk [vmem:[%s201_s16] sm:$0x1] %vm202_vm11, %v199_v29 }
 0x274   : > { %v286_v30 = vpop.permute.xlu0 %285 }
 0x275   : > { %289 = vst.msk [vmem:[%s288_s19] sm:$0x1] %vm202_vm11, %v286_v30 }
 0x277   : > { %v300_v31 = vpop.permute.xlu2 %299  }
 0x278   : > { %v692_v10 = vmov %v300_v31  ;;  %316 = vst.msk [vmem:[#allocation3] sm:$0x3] (%p106_p0), %vm87_vm0, %v300_v31 }
 0x287   : > { %v294_v32 = vpop.permute.xlu1 %293  }
 0x288   : > { %v693_v9 = vmov %v294_v32  ;;  %315 = vst.msk [vmem:[#allocation2] sm:$0x3] (%p106_p0), %vm87_vm0, %v294_v32 }
 0x297   : > { %v306_v33 = vpop.permute.xlu0 %305  }
 0x298   : > { %v691_v11 = vmov %v306_v33  ;;  %317 = vst.msk [vmem:[#allocation4] sm:$0x3] (%p106_p0), %vm87_vm0, %v306_v33 }
 0x29c   :  { %108 = sbr.rel (!%p106_p0) target bundleno = 23 (0x17), region = 74 }
 0x29f   : > { %v312_v34 = vpop.permute.xlu1 %311  }
 0x2a0   : > { %v690_v12 = vmov %v312_v34  ;;  %318 = vst.msk [vmem:[#allocation5] sm:$0x3] (%p106_p0), %vm87_vm0, %v312_v34 }
 0x2a1   :  { %339 = vsyncpa [#allocation7], 1 }
 0x2a2   :  { %340 = vsyncpa [#allocation9], 1 }

// kernel: bilstm_with_attention.7
= control target key start
LH: loop header
LB: loop body
LE: loop exit
PB: predicated region body
PF: predicated region fallthrough
CT: control target
= control target key end

     0   :  { %15 = vsyncpa [#allocation3], 0  ;;  %s489_s0 = inlined_call_operand.vmem [shape: bf16[16,32], index: 0, kind: input, shape index: {}]   ;;  %s490_s1 = inlined_call_operand.vmem [shape: bf16[16,32], index: 1, kind: input, shape index: {}]   ;;  %s491_s2 = inlined_call_operand.vmem [shape: bf16[32,128], index: 2, kind: input, shape index: {}]   ;;  %s492_s3 = inlined_call_operand.hbm [shape: bf16[32,128], index: 3, kind: input, shape index: {}]   ;;  %s493_s4 = inlined_call_operand.hbm [shape: bf16[32,128], index: 4, kind: input, shape index: {}]   ;;  %s494_s5 = inlined_call_operand.hbm [shape: bf16[32,128], index: 5, kind: input, shape index: {}]   ;;  %s495_s6 = inlined_call_operand.vmem [shape: f32[1,128], index: 6, kind: input, shape index: {}]   ;;  %s496_s7 = inlined_call_operand.vmem [shape: f32[1,128], index: 7, kind: input, shape index: {}]   ;;  %s497_s8 = inlined_call_operand.vmem [shape: bf16[16,128], index: 8, kind: output, shape index: {0}]   ;;  %s498_s9 = inlined_call_operand.vmem [shape: bf16[16,128], index: 9, kind: output, shape index: {1}]  }
   0x1   :  { %16 = vsyncpa [#allocation5], 0  ;;  %s40_s11 = sshll.u32 %s493_s4, 4  ;;  %s401_s12 = smov [#allocation4]   ;;  %s41_s11 = int_to_ptr.hbm [resolvable:$true] %s40_s11 }
   0x2   :  { %s42_s13 = sshll.u32 %s401_s12, 4  ;;  %s27_s16 = sshll.u32 %s492_s3, 4  ;;  %s43_s13 = int_to_ptr.vmem [resolvable:$true] %s42_s13  ;;  %s28_s16 = int_to_ptr.hbm [resolvable:$true] %s27_s16 }
   0x3   :  { %s402_s17 = smov 64   ;;  %s403_s18 = smov 4  }
   0x4   :  { %48 = dma.hbm_to_vmem [thread:$0]  %s41_s11, 256, %s43_s13, [#allocation5], %s402_s17, %s402_s17, %s403_s18  }
   0x5   :  { %s404_s19 = smov [#allocation2]   ;;  %s53_s23 = sshll.u32 %s494_s5, 4  ;;  %s54_s23 = int_to_ptr.hbm [resolvable:$true] %s53_s23 }
   0x6   :  { %s29_s20 = sshll.u32 %s404_s19, 4  ;;  %s405_s4 = smov [#allocation6]   ;;  %s30_s20 = int_to_ptr.vmem [resolvable:$true] %s29_s20 }
   0x7   :  { %35 = dma.hbm_to_vmem [thread:$0]  %s28_s16, 256, %s30_s20, [#allocation3], %s402_s17, %s402_s17, %s403_s18  }
   0x8   :  { %s55_s24 = sshll.u32 %s405_s4, 4  ;;  %s56_s24 = int_to_ptr.vmem [resolvable:$true] %s55_s24 }
   0x9   :  { %61 = dma.hbm_to_vmem [thread:$0]  %s54_s23, 256, %s56_s24, [#allocation5], %s402_s17, %s402_s17, %s403_s18  }
   0xa   :  { %397 = dma.done.wait [#allocation3], 256  }
   0xb   :  { %398 = vsyncadd [#allocation3], 4294967040 }
   0xc   :  { %399 = dma.done.wait [#allocation5], 512  }
   0xd   :  { %400 = vsyncadd [#allocation5], 4294966784  ;;  %v300_v0 = vld [vmem:[%s491_s2 + $0x8] sm:$0xff]  ;;  %v302_v1 = vld [vmem:[#allocation4 + $0x8] sm:$0xff]  ;;  %vm104_vm0 = vcmask 261120  }
   0xe   :  { %v305_v2 = vld [vmem:[#allocation2 + $0x8] sm:$0xff]  ;;  %114 = vmatpush.bf16.msra.mxu0 %v300_v0  ;;  %149 = vmatpush.bf16.msra.mxu1 %v302_v1  ;;  %v299_v4 = vld [vmem:[%s491_s2] sm:$0xff]  ;;  %v301_v5 = vld [vmem:[#allocation4] sm:$0xff] }
   0xf   :  { %v307_v3 = vld [vmem:[#allocation6 + $0x8] sm:$0xff]  ;;  %v304_v6 = vld [vmem:[#allocation2] sm:$0xff]  ;;  %194 = vmatpush.bf16.msra.mxu2 %v305_v2 }
  0x10   :  { %226 = vmatpush.bf16.msra.mxu3 %v307_v3  ;;  %v306_v7 = vld [vmem:[#allocation6] sm:$0xff] }
  0x11   :  { %v298_v8 = vld [vmem:[%s489_s0] sm:$0xff] }
  0x12   :  { %115 = vmatpush.bf16.msra.mxu0 %v299_v4  ;;  %150 = vmatpush.bf16.msra.mxu1 %v301_v5  ;;  %v303_v9 = vld [vmem:[%s490_s1] sm:$0xff] }
  0x13   :  { %195 = vmatpush.bf16.msra.mxu2 %v304_v6  ;;  %v323_v14 = vld [vmem:[%s495_s6] ss:$0 sm:$0xff] }
  0x14   :  { %227 = vmatpush.bf16.msra.mxu3 %v306_v7  ;;  %v324_v15 = vld [vmem:[%s496_s7] ss:$0 sm:$0xff] }
  0x15   :  { %266 = vmatmul.msk.bf16.vlgmr.msra.gmra.mxu0 %vm104_vm0, %v298_v8  ;;  %275 = vmatmul.msk.bf16.vlgmr.msra.gmra.mxu1 %vm104_vm0, %v298_v8 }
  0x16   :  { %288 = vmatmul.msk.bf16.vlgmr.msra.gmra.mxu2 %vm104_vm0, %v303_v9 }
  0x17   :  { %297 = vmatmul.msk.bf16.vlgmr.msra.gmra.mxu3 %vm104_vm0, %v303_v9 }
  0x92   :  { %v117_v10 = vpop.f32.mrf.mxu0  ;;  %v152_v11 = vpop.f32.mrf.mxu1 }
  0x93   :  { %v125_v18 = vadd.f32 %v323_v14, %v117_v10  ;;  %v160_v19 = vadd.f32 %v324_v15, %v152_v11 }
  0x99   :  { %v197_v12 = vpop.f32.mrf.mxu2 }
  0x9a   :  { %v229_v13 = vpop.f32.mrf.mxu3  ;;  %v119_v16 = vpop.f32.mrf.mxu0  ;;  %v202_v24 = vadd.f32 %v197_v12, %v125_v18 }
  0x9b   :  { %v154_v17 = vpop.f32.mrf.mxu1  ;;  %v126_v20 = vadd.f32 %v323_v14, %v119_v16  ;;  %v234_v25 = vadd.f32 %v229_v13, %v160_v19 }
  0x9c   :  { %v161_v21 = vadd.f32 %v324_v15, %v154_v17 }
  0xa1   :  { %v199_v22 = vpop.f32.mrf.mxu2 }
  0xa2   :  { %v231_v23 = vpop.f32.mrf.mxu3  ;;  %v203_v26 = vadd.f32 %v199_v22, %v126_v20 }
  0xa3   :  { %v235_v27 = vadd.f32 %v231_v23, %v161_v21 }
  0xa4   :  { %v311_v28 = vpack.c.bf16 %v203_v26, %v202_v24 }
  0xa5   :  { %v316_v29 = vpack.c.bf16 %v235_v27, %v234_v25 }
  0xa6   :  { %312 = vst [vmem:[%s497_s8] sm:$0xff] %v311_v28  }
  0xa7   :  { %317 = vst [vmem:[%s498_s9] sm:$0xff] %v316_v29  }
  0xa8   :  { %252 = vsyncpa [#allocation3], 1 }
  0xa9   :  { %253 = vsyncpa [#allocation5], 1 }

// kernel: bilstm_with_attention.9
= control target key start
LH: loop header
LB: loop body
LE: loop exit
PB: predicated region body
PF: predicated region fallthrough
CT: control target
= control target key end

     0   :  { %vm43_vm0 = vcmask 254976   ;;  %v500_v26 = vmov 0   ;;  %vm40_vm1 = vcmask 8192   ;;  %vm194_vm2 = vcmask 1041409   ;;  %s811_s1 = inlined_call_operand.vmem [shape: bf16[8,2,32], index: 1, kind: input, shape index: {}]   ;;  %s812_s4 = inlined_call_operand.vmem [shape: f32[1,32], index: 4, kind: input, shape index: {}]   ;;  %s813_s0 = inlined_call_operand.vmem [shape: bf16[8,2,32], index: 0, kind: input, shape index: {}]   ;;  %s814_s3 = inlined_call_operand.vmem [shape: f32[1,32], index: 3, kind: input, shape index: {}]   ;;  %s815_s5 = inlined_call_operand.<no memory space> [shape: f32[1,1], index: 5, kind: input, shape index: {}]   ;;  %s816_s2 = inlined_call_operand.vmem [shape: f32[8,2], index: 2, kind: input, shape index: {}]   ;;  %s817_s6 = inlined_call_operand.vmem [shape: f32[1,32], index: 6, kind: input, shape index: {}]   ;;  %s818_s7 = inlined_call_operand.vmem [shape: f32[1,32], index: 7, kind: input, shape index: {}]   ;;  %s819_s8 = inlined_call_operand.<no memory space> [shape: f32[1,1], index: 8, kind: input, shape index: {}]   ;;  %s820_s9 = inlined_call_operand.vmem [shape: f32[2,1], index: 9, kind: output, shape index: {}]  }
   0x1   :  { %v556_v0 = vld [vmem:[%s811_s1] sm:$0x1]  ;;  %v567_v3 = vld [vmem:[%s813_s0 + $0x2] sm:$0x1]  ;;  %v583_v7 = vld [vmem:[%s811_s1 + $0x1] sm:$0x1]  ;;  %480 = vset.pattern.permute.xlu1 %v500_v26  ;;  %v14_v27 = vstv %s815_s5 }
   0x2   :  { %v561_v1 = vld [vmem:[%s812_s4] ss:$0 sm:$0xff]  ;;  %v70_v2 = vunpack.c.l.bf16 %v556_v0  ;;  %v56_v5 = vunpack.c.l.bf16 %v567_v3  ;;  %v588_v8 = vld [vmem:[%s811_s1 + $0x2] sm:$0x1]  ;;  %v71_v11 = vunpack.c.l.bf16 %v583_v7  ;;  %v598_v12 = vld [vmem:[%s813_s0 + $0x1] sm:$0x1] }
   0x3   :  { %v572_v4 = vld [vmem:[%s814_s3] ss:$0 sm:$0xff]  ;;  %v72_v14 = vunpack.c.l.bf16 %v588_v8  ;;  %v55_v17 = vunpack.c.l.bf16 %v598_v12  ;;  %v620_v22 = vld [vmem:[%s811_s1 + $0x3] sm:$0x1]  ;;  %v628_v24 = vld [vmem:[%s813_s0 + $0x4] sm:$0x1] }
   0x4   :  { %v578_v6 = vld [vmem:[%s813_s0] sm:$0x1]  ;;  %v119_v9 = vmul.f32 %v561_v1, %v70_v2  ;;  %v84_v13 = vmul.f32 %v572_v4, %v56_v5  ;;  %v120_v20 = vmul.f32 %v561_v1, %v71_v11  ;;  %v633_v25 = vld [vmem:[%s813_s0 + $0x3] sm:$0x1]  ;;  %v73_v29 = vunpack.c.l.bf16 %v620_v22  ;;  %15 = vst [vmem:[#allocation6] sm:$0x1] %v14_v27 }
   0x5   :  { %v54_v10 = vunpack.c.l.bf16 %v578_v6  ;;  %v121_v21 = vmul.f32 %v561_v1, %v72_v14  ;;  %v83_v23 = vmul.f32 %v572_v4, %v55_v17  ;;  %v58_v31 = vunpack.c.l.bf16 %v628_v24  ;;  %v657_v37 = vld [vmem:[%s813_s0 + $0x5] sm:$0x1]  ;;  %v662_v38 = vld [vmem:[%s811_s1 + $0x4] sm:$0x1]  ;;  %v678_v46 = vld [vmem:[%s813_s0 + $0x6] sm:$0x1] }
   0x6   :  { %v127_v15 = vsel %vm43_vm0, %v119_v9, 0.0  ;;  %v97_v18 = vsel %vm43_vm0, %v84_v13, 0.0  ;;  %v130_v28 = vsel %vm43_vm0, %v120_v20, 0.0  ;;  %v57_v33 = vunpack.c.l.bf16 %v633_v25  ;;  %v683_v47 = vld [vmem:[%s811_s1 + $0x5] sm:$0x1] }
   0x7   :  { %v82_v16 = vmul.f32 %v572_v4, %v54_v10  ;;  %128 = vadd.xlane.f32.xlu1 %v127_v15  ;;  %98 = vadd.xlane.f32.xlu2 %v97_v18  ;;  %v133_v30 = vsel %vm43_vm0, %v121_v21, 0.0  ;;  %v94_v32 = vsel %vm43_vm0, %v83_v23, 0.0  ;;  %v122_v34 = vmul.f32 %v561_v1, %v73_v29  ;;  %v698_v54 = vld [vmem:[%s813_s0 + $0x7] sm:$0x1]  ;;  %v703_v55 = vld [vmem:[%s811_s1 + $0x6] sm:$0x1] }
   0x8   :  { %v86_v35 = vmul.f32 %v572_v4, %v58_v31  ;;  %v85_v36 = vmul.f32 %v572_v4, %v57_v33  ;;  %v59_v41 = vunpack.c.l.bf16 %v657_v37  ;;  %v74_v43 = vunpack.c.l.bf16 %v662_v38  ;;  %v718_v62 = vld [vmem:[%s811_s1 + $0x7] sm:$0x1] }
   0x9   :  { %v91_v19 = vsel %vm43_vm0, %v82_v16, 0.0  ;;  %v136_v39 = vsel %vm43_vm0, %v122_v34, 0.0  ;;  %v60_v49 = vunpack.c.l.bf16 %v678_v46  ;;  %v75_v51 = vunpack.c.l.bf16 %v683_v47 }
   0xa   :  { %92 = vadd.xlane.f32.xlu0 %v91_v19  ;;  %v103_v40 = vsel %vm43_vm0, %v86_v35, 0.0  ;;  %v100_v42 = vsel %vm43_vm0, %v85_v36, 0.0  ;;  %v87_v44 = vmul.f32 %v572_v4, %v59_v41  ;;  %v123_v45 = vmul.f32 %v561_v1, %v74_v43 }
   0xb   :  { %v88_v52 = vmul.f32 %v572_v4, %v60_v49  ;;  %v124_v53 = vmul.f32 %v561_v1, %v75_v51  ;;  %v61_v57 = vunpack.c.l.bf16 %v698_v54  ;;  %v76_v59 = vunpack.c.l.bf16 %v703_v55  ;;  %v490_v63 = vld [vmem:[#allocation6] ss:$0 sm:$0xff]  ;;  %v491_v54 = vld [vmem:[%s817_s6] ss:$0 sm:$0xff] }
   0xc   :  { %v106_v48 = vsel %vm43_vm0, %v87_v44, 0.0  ;;  %v139_v50 = vsel %vm43_vm0, %v123_v45, 0.0  ;;  %v821_v15 = vunpack.c.l.bf16 %v718_v62  ;;  %v184_v36 = vlaneseq }
   0xd   :  { %v109_v56 = vsel %vm43_vm0, %v88_v52, 0.0  ;;  %v142_v58 = vsel %vm43_vm0, %v124_v53, 0.0  ;;  %v89_v60 = vmul.f32 %v572_v4, %v61_v57  ;;  %v125_v61 = vmul.f32 %v561_v1, %v76_v59 }
   0xe   :  { %v126_v4 = vmul.f32 %v561_v1, %v821_v15  ;;  %v185_v53 = vand.u32 127, %v184_v36  ;;  %vm196_vm3 = vcmask 1042434   ;;  %vm198_vm4 = vcmask 1043459  }
   0xf   :  { %131 = vadd.xlane.f32.xlu1 %v130_v28  ;;  %134 = vadd.xlane.f32.xlu2 %v133_v30  ;;  %v112_v9 = vsel %vm43_vm0, %v89_v60, 0.0  ;;  %v145_v13 = vsel %vm43_vm0, %v125_v61, 0.0  ;;  %vm200_vm5 = vcmask 1044484   ;;  %vm202_vm6 = vcmask 1045509  }
  0x10   :  { %v148_v16 = vsel %vm43_vm0, %v126_v4, 0.0  ;;  %vm204_vm7 = vcmask 1046534   ;;  %vm206_vm8 = vcmask 1047559   ;;  %vm211_vm10 = vcmask 15360  }
  0x11   :  { %vm471_vm15 = vcmask 1024  }
  0x12   :  { %95 = vadd.xlane.f32.xlu0 %v94_v32 }
  0x17   :  { %137 = vadd.xlane.f32.xlu1 %v136_v39  ;;  %104 = vadd.xlane.f32.xlu2 %v103_v40  ;;  %v501_v39 = vmov -inf   ;;  %v728_v40 = vshrl.u32 %v184_v36, 7 }
  0x18   :  { %41 = vst.msk [vmem:[#allocation2] sm:$0x1] %vm40_vm1, %v501_v39 }
  0x19   :  { %481 = vset.pattern.permute.xlu0 %v728_v40 }
  0x1a   :  { %101 = vadd.xlane.f32.xlu0 %v100_v42  ;;  %v502_v42 = vmov 0.0  }
  0x1b   :  { %42 = vst.msk [vmem:[#allocation3] sm:$0x1] %vm40_vm1, %v502_v42 }
  0x1c   :  { %44 = vst.msk [vmem:[#allocation4] sm:$0x3] %vm43_vm0, %v502_v42 }
  0x1d   :  { %45 = vst.msk [vmem:[#allocation5] sm:$0x3] %vm43_vm0, %v502_v42 }
  0x1f   :  { %107 = vadd.xlane.f32.xlu2 %v106_v48 }
  0x22   :  { %140 = vadd.xlane.f32.xlu0 %v139_v50 }
  0x27   :  { %110 = vadd.xlane.f32.xlu2 %v109_v56 }
  0x2a   :  { %143 = vadd.xlane.f32.xlu0 %v142_v58 }
  0x2f   :  { %113 = vadd.xlane.f32.xlu2 %v112_v9 }
  0x30   :  { %163 = vperm.xlu1 %480, %v490_v63  }
  0x32   :  { %146 = vadd.xlane.f32.xlu0 %v145_v13 }
  0x38   :  { %482 = vset.pattern.permute.xlu1 %v728_v40 }
  0x3a   :  { %149 = vadd.xlane.f32.xlu0 %v148_v16 }
  0x7a   :  { %v99_v18 = vpop.xlane.xlu2 %98  ;;  %v129_v23 = vpop.xlane.xlu1 %128 }
  0x7d   :  { %v93_v19 = vpop.xlane.xlu0 %92 }
  0x7e   :  { %v151_v44 = vadd.f32 %v129_v23, %v93_v19 }
  0x82   :  { %v135_v20 = vpop.xlane.xlu2 %134  ;;  %v132_v30 = vpop.xlane.xlu1 %131 }
  0x83   :  { %v153_v48 = vadd.f32 %v135_v20, %v99_v18 }
  0x85   :  { %v96_v21 = vpop.xlane.xlu0 %95 }
  0x86   :  { %v152_v50 = vadd.f32 %v132_v30, %v96_v21 }
  0x8a   :  { %v105_v28 = vpop.xlane.xlu2 %104  ;;  %v138_v35 = vpop.xlane.xlu1 %137 }
  0x8d   :  { %v102_v27 = vpop.xlane.xlu0 %101 }
  0x8e   :  { %v154_v52 = vadd.f32 %v138_v35, %v102_v27 }
  0x92   :  { %v108_v34 = vpop.xlane.xlu2 %107 }
  0x95   :  { %v141_v32 = vpop.xlane.xlu0 %140 }
  0x96   :  { %v155_v9 = vadd.f32 %v141_v32, %v105_v28 }
  0x9a   :  { %v111_v45 = vpop.xlane.xlu2 %110 }
  0x9d   :  { %v144_v1 = vpop.xlane.xlu0 %143 }
  0x9e   :  { %v156_v19 = vadd.f32 %v144_v1, %v108_v34 }
  0xa2   :  { %v164_v56 = vpop.permute.xlu1 %163  ;;  %v114_v36 = vpop.xlane.xlu2 %113 }
  0xa3   :  { %v166_v58 = vadd.f32 %v164_v56, %v151_v44  ;;  %v167_v60 = vadd.f32 %v164_v56, %v152_v50  ;;  %v168_v61 = vadd.f32 %v164_v56, %v153_v48  ;;  %v169_v63 = vadd.f32 %v164_v56, %v154_v52  ;;  %v174_v50 = vld [vmem:[%s816_s2] sm:$0xff] }
  0xa4   :  { %v170_v15 = vadd.f32 %v164_v56, %v155_v9  ;;  %v171_v27 = vadd.f32 %v164_v56, %v156_v19  ;;  %vm175_vm9 = vcmp.eq.f32.partialorder %v174_v50, 0.0  ;;  %v261_v50 = vld [vmem:[#allocation3] sm:$0x1] }
  0xa5   :  { %v147_v13 = vpop.xlane.xlu0 %146  ;;  %v186_v4 = vperm.slane %v166_v58, %v185_v53  ;;  %v187_v16 = vperm.slane %v167_v60, %v185_v53  ;;  %v188_v39 = vperm.slane %v168_v61, %v185_v53  ;;  %v189_v23 = vperm.slane %v169_v63, %v185_v53 }
  0xa6   :  { %v157_v21 = vadd.f32 %v147_v13, %v111_v45  ;;  %v190_v35 = vperm.slane %v170_v15, %v185_v53  ;;  %v191_v44 = vperm.slane %v171_v27, %v185_v53 }
  0xa7   :  { %v195_v18 = vsel %vm194_vm2, %v187_v16, %v186_v4 }
  0xa8   :  { %v197_v20 = vsel %vm196_vm3, %v188_v39, %v195_v18  ;;  %v172_v28 = vadd.f32 %v164_v56, %v157_v21  ;;  %v210_v39 = vld [vmem:[#allocation2] sm:$0x1] }
  0xa9   :  { %v199_v30 = vsel %vm198_vm4, %v189_v23, %v197_v20 }
  0xaa   :  { %v201_v42 = vsel %vm200_vm5, %v190_v35, %v199_v30  ;;  %v192_v52 = vperm.slane %v172_v28, %v185_v53 }
  0xab   :  { %v203_v34 = vsel %vm202_vm6, %v191_v44, %v201_v42 }
  0xac   :  { %v205_v58 = vsel %vm204_vm7, %v192_v52, %v203_v34 }
  0xad   :  { %v150_v32 = vpop.xlane.xlu0 %149 }
  0xae   :  { %v158_v48 = vadd.f32 %v150_v32, %v114_v36 }
  0xb0   :  { %v173_v1 = vadd.f32 %v164_v56, %v158_v48 }
  0xb2   :  { %v193_v45 = vperm.slane %v173_v1, %v185_v53 }
  0xb4   :  { %v207_v15 = vsel %vm206_vm8, %v193_v45, %v205_v58 }
  0xb5   :  { %v209_v60 = vsel %vm175_vm9, -1e+09, %v207_v15 }
  0xb6   :  { %v212_v61 = vsel %vm211_vm10, %v209_v60, -inf }
  0xb7   :  { %v213_v63 = vrot.slane %v212_v61, 4 }
  0xb9   :  { %v214_v9 = vmax.f32 %v212_v61, %v213_v63 }
  0xbb   :  { %v215_v13 = vrot.slane %v214_v9, 2 }
  0xbd   :  { %v216_v4 = vmax.f32 %v214_v9, %v215_v13 }
  0xbf   :  { %v217_v16 = vrot.slane %v216_v4, 1 }
  0xc1   :  { %v218_v19 = vmax.f32 %v216_v4, %v217_v16 }
  0xc3   :  { %v219_v23 = vmax.f32 %v210_v39, %v218_v19 }
  0xc5   :  { %v220_v18 = vsub.f32 %v210_v39, %v219_v23  ;;  %v224_v56 = vperm.slane %v219_v23, 0  ;;  %388 = vst.msk [vmem:[#allocation2] sm:$0x1] %vm40_vm1, %v219_v23 }
  0xc7   :  { %v221_v20 = vmul.f32 1.442695, %v220_v18  ;;  %v226_v53 = vsub.f32 %v209_v60, %v224_v56 }
  0xc9   :  { %494 = vpow2.f32 %v221_v20  ;;  %v227_v21 = vmul.f32 1.442695, %v226_v53 }
  0xcb   :  { %496 = vpow2.f32 %v227_v21 }
  0xcf   :  { %v495_v27 = vpop.eup %494 }
  0xd0   :  { %229 = vxpose.xlu2.b32.start.end [1/1] (short) (narrow) %v495_v27, 8  ;;  %v262_v45 = vmul.f32 %v495_v27, %v261_v50 }
  0xd1   :  { %v497_v30 = vpop.eup %496 }
  0xd2   :  { %v263_v35 = vsel %vm211_vm10, %v497_v30, 0.0  ;;  %v287_v36 = vperm.slane %v497_v30, 1  ;;  %v280_v42 = vperm.slane %v497_v30, 0  ;;  %v294_v34 = vperm.slane %v497_v30, 2 }
  0xd3   :  { %v264_v28 = vrot.slane %v263_v35, 4  ;;  %v301_v15 = vperm.slane %v497_v30, 3  ;;  %v308_v61 = vperm.slane %v497_v30, 4  ;;  %v315_v13 = vperm.slane %v497_v30, 5 }
  0xd4   :  { %292 = vperm.xlu1 %482, %v287_v36   ;;  %285 = vperm.xlu0 %481, %v280_v42   ;;  %v322_v53 = vperm.slane %v497_v30, 6  ;;  %v329_v27 = vperm.slane %v497_v30, 7 }
  0xd5   :  { %v265_v32 = vadd.f32 %v264_v28, %v263_v35 }
  0xd7   :  { %v266_v44 = vrot.slane %v265_v32, 2 }
  0xd9   :  { %v267_v48 = vadd.f32 %v266_v44, %v265_v32 }
  0xdb   :  { %v268_v1 = vrot.slane %v267_v48, 1 }
  0xdc   :  { %299 = vperm.xlu1 %482, %v294_v34  }
  0xdd   :  { %v269_v52 = vadd.f32 %v268_v1, %v267_v48 }
  0xdf   :  { %v270_v58 = vadd.f32 %v269_v52, %v262_v45 }
  0xe1   :  { %272 = vst.msk [vmem:[#allocation3] sm:$0x1] %vm40_vm1, %v270_v58 }
  0xe4   :  { %306 = vperm.xlu1 %482, %v301_v15  }
  0xe8   :  { %v392_v60 = vld [vmem:[#allocation3] sm:$0x1] }
  0xe9   :  { %498 = vrcp.f32 %v392_v60  ;;  %v404_v16 = vand.u32 2147483648, %v392_v60  ;;  %v402_v19 = vand.u32 2147483647, %v392_v60  ;;  %vm398_vm12 = vweird.f32 %v392_v60 }
  0xeb   :  { %v405_v18 = vor.u32 1.1754944e-38, %v404_v16  ;;  %vm403_vm14 = vcmp.eq.f32.partialorder %v402_v19, 8.507059e+37 }
  0xec   :  { %313 = vperm.xlu1 %482, %v308_v61  }
  0xef   :  { %v499_v63 = vpop.eup %498 }
  0xf0   :  { %v394_v9 = vmul.f32 %v499_v63, %v392_v60  ;;  %vm399_vm11 = vweird.f32 %v499_v63 }
  0xf1   :  { %vm400_vm13 = vmor %vm398_vm12, %vm399_vm11 }
  0xf2   :  { %v395_v4 = vsub.f32 1.0, %v394_v9 }
  0xf4   :  { %320 = vperm.xlu1 %482, %v315_v13   ;;  %v396_v39 = vmul.f32 %v499_v63, %v395_v4  ;;  %v273_v13 = vld [vmem:[#allocation4] sm:$0x3]  ;;  %v361_v4 = vld [vmem:[#allocation5] sm:$0x3] }
  0xf6   :  { %v397_v23 = vadd.f32 %v499_v63, %v396_v39 }
  0xf8   :  { %v401_v56 = vsel %vm400_vm13, %v499_v63, %v397_v23 }
  0xf9   :  { %v406_v20 = vsel %vm403_vm14, %v405_v18, %v401_v56 }
  0xfa   :  { %408 = vxpose.xlu0.b32.start.end [1/1] (short) (narrow) %v406_v20, 8 }
  0xfc   :  { %484 = vset.pattern.permute.xlu1 %v500_v26 }
 0x132   :  { %483 = vset.pattern.permute.xlu2 %v728_v40 }
 0x13a   :  { %327 = vperm.xlu2 %483, %v322_v53  }
 0x146   :  { %v286_v35 = vpop.permute.xlu0 %285  ;;  %v293_v42 = vpop.permute.xlu1 %292 }
 0x147   :  { %v337_v50 = vmul.f32 %v293_v42, %v55_v17  ;;  %v364_v34 = vmul.f32 %v293_v42, %v71_v11 }
 0x149   :  { %v345_v52 = vsel %vm43_vm0, %v337_v50, 0.0  ;;  %v372_v12 = vsel %vm43_vm0, %v364_v34, 0.0 }
 0x14e   :  { %v300_v28 = vpop.permute.xlu1 %299 }
 0x14f   :  { %v338_v30 = vmul.f32 %v300_v28, %v56_v5  ;;  %v365_v1 = vmul.f32 %v300_v28, %v72_v14 }
 0x151   :  { %v347_v3 = vsel %vm43_vm0, %v338_v30, 0.0  ;;  %v374_v5 = vsel %vm43_vm0, %v365_v1, 0.0 }
 0x156   :  { %v307_v32 = vpop.permute.xlu1 %306 }
 0x157   :  { %v339_v6 = vmul.f32 %v307_v32, %v57_v33  ;;  %v366_v0 = vmul.f32 %v307_v32, %v73_v29 }
 0x159   :  { %v349_v25 = vsel %vm43_vm0, %v339_v6, 0.0  ;;  %v376_v33 = vsel %vm43_vm0, %v366_v0, 0.0 }
 0x15e   :  { %v314_v44 = vpop.permute.xlu1 %313 }
 0x15f   :  { %v340_v8 = vmul.f32 %v314_v44, %v58_v31 }
 0x161   :  { %487 = vset.pattern.permute.xlu0 %v500_v26  ;;  %v351_v24 = vsel %vm43_vm0, %v340_v8, 0.0 }
 0x166   :  { %v321_v48 = vpop.permute.xlu1 %320 }
 0x167   :  { %v341_v22 = vmul.f32 %v321_v48, %v59_v41  ;;  %v368_v29 = vmul.f32 %v321_v48, %v75_v51 }
 0x169   :  { %v245_v21 = vpop.trf.xlu2  ;;  %v353_v37 = vsel %vm43_vm0, %v341_v22, 0.0  ;;  %v380_v41 = vsel %vm43_vm0, %v368_v29, 0.0 }
 0x16a   :  { %276 = vperm.xlu1 %484, %v245_v21  }
 0x172   :  { %485 = vset.pattern.permute.xlu1 %v728_v40  ;;  %v336_v40 = vmul.f32 %v286_v35, %v54_v10  ;;  %v367_v10 = vmul.f32 %v314_v44, %v74_v43 }
 0x174   :  { %v344_v17 = vsel %vm43_vm0, %v336_v40, 0.0  ;;  %v378_v31 = vsel %vm43_vm0, %v367_v10, 0.0 }
 0x175   :  { %v346_v11 = vadd.f32 %v345_v52, %v344_v17 }
 0x177   :  { %v348_v58 = vadd.f32 %v347_v3, %v346_v11 }
 0x179   :  { %v350_v60 = vadd.f32 %v349_v25, %v348_v58 }
 0x17a   :  { %334 = vperm.xlu1 %485, %v329_v27  }
 0x17b   :  { %v352_v47 = vadd.f32 %v351_v24, %v350_v60 }
 0x17d   :  { %v354_v16 = vadd.f32 %v353_v37, %v352_v47 }
 0x182   :  { %486 = vset.pattern.permute.xlu1 %v500_v26  ;;  %v363_v26 = vmul.f32 %v286_v35, %v70_v2 }
 0x184   :  { %v371_v7 = vsel %vm43_vm0, %v363_v26, 0.0  ;;  %v16_v26 = vstv %s819_s8 }
 0x185   :  { %v373_v14 = vadd.f32 %v372_v12, %v371_v7  ;;  %17 = vst [vmem:[#allocation7] sm:$0x1] %v16_v26 }
 0x187   :  { %v375_v15 = vadd.f32 %v374_v5, %v373_v14 }
 0x189   :  { %v377_v61 = vadd.f32 %v376_v33, %v375_v15 }
 0x18b   :  { %v379_v51 = vadd.f32 %v378_v31, %v377_v61 }
 0x18c   :  { %v493_v30 = vld [vmem:[#allocation7] ss:$0 sm:$0xff] }
 0x18d   :  { %v381_v46 = vadd.f32 %v380_v41, %v379_v51 }
 0x194   :  { %v328_v45 = vpop.permute.xlu2 %327 }
 0x195   :  { %v342_v38 = vmul.f32 %v328_v45, %v60_v49  ;;  %v369_v43 = vmul.f32 %v328_v45, %v76_v59  ;;  %v822_v59 = vunpack.c.l.bf16 %v718_v62 }
 0x197   :  { %v355_v63 = vsel %vm43_vm0, %v342_v38, 0.0  ;;  %v382_v9 = vsel %vm43_vm0, %v369_v43, 0.0 }
 0x198   :  { %v356_v19 = vadd.f32 %v355_v63, %v354_v16  ;;  %v383_v23 = vadd.f32 %v382_v9, %v381_v46 }
 0x19e   :  { %v424_v36 = vpop.trf.xlu0 }
 0x19f   :  { %443 = vperm.xlu1 %486, %v424_v36  }
 0x1dc   :  { %v277_v2 = vpop.permute.xlu1 %276 }
 0x1dd   :  { %v279_v18 = vmul.f32 %v277_v2, %v273_v13  ;;  %v362_v56 = vmul.f32 %v361_v4, %v277_v2 }
 0x1ec   :  { %v335_v49 = vpop.permute.xlu1 %334 }
 0x1ed   :  { %v343_v55 = vmul.f32 %v335_v49, %v61_v57  ;;  %v370_v39 = vmul.f32 %v335_v49, %v822_v59  ;;  %v492_v57 = vld [vmem:[%s818_s7] ss:$0 sm:$0xff] }
 0x1ef   :  { %v357_v20 = vsel %vm43_vm0, %v343_v55, 0.0  ;;  %v384_v53 = vsel %vm43_vm0, %v370_v39, 0.0 }
 0x1f0   :  { %v358_v21 = vadd.f32 %v357_v20, %v356_v19  ;;  %v385_v27 = vadd.f32 %v384_v53, %v383_v23 }
 0x1f2   :  { %v359_v35 = vadd.f32 %v358_v21, %v279_v18  ;;  %v386_v36 = vadd.f32 %v385_v27, %v362_v56 }
 0x1f4   :  { %360 = vst.msk [vmem:[#allocation4] sm:$0x3] %vm43_vm0, %v359_v35 }
 0x1f5   :  { %387 = vst.msk [vmem:[#allocation5] sm:$0x3] %vm43_vm0, %v386_v36 }
 0x1fb   :  { %v440_v62 = vld [vmem:[#allocation4] sm:$0x3] }
 0x1fc   :  { %v447_v42 = vld [vmem:[#allocation5] sm:$0x3] }
 0x211   :  { %v444_v28 = vpop.permute.xlu1 %443 }
 0x212   :  { %v446_v32 = vmul.f32 %v444_v28, %v440_v62  ;;  %v448_v44 = vmul.f32 %v447_v42, %v444_v28 }
 0x214   :  { %v453_v48 = vmul.f32 %v491_v54, %v446_v32  ;;  %v461_v50 = vmul.f32 %v492_v57, %v448_v44 }
 0x216   :  { %v454_v34 = vsel %vm43_vm0, %v453_v48, 0.0  ;;  %v462_v40 = vsel %vm43_vm0, %v461_v50, 0.0 }
 0x217   :  { %455 = vadd.xlane.f32.xlu1 %v454_v34  ;;  %463 = vadd.xlane.f32.xlu0 %v462_v40 }
 0x28a   :  { %v456_v1 = vpop.xlane.xlu1 %455  ;;  %v464_v52 = vpop.xlane.xlu0 %463 }
 0x28b   :  { %v465_v12 = vadd.f32 %v464_v52, %v456_v1 }
 0x28d   :  { %v470_v17 = vadd.f32 %v493_v30, %v465_v12 }
 0x28f   :  { %472 = vst.msk [vmem:[%s820_s9] sm:$0x3] %vm471_vm15, %v470_v17 }

</bundles_post_ra>
